<compile_context>
chip_gen: v5e
topology: v5e:2x2
jax: 0.10.0
libtpu: 0.0.40
codegen_flags: <defaults>
</compile_context>

<pallas_src>
import numpy as np
import jax
import jax.numpy as jnp
from jax import lax
from jax.experimental import pallas as pl
from jax.experimental.pallas import tpu as pltpu


def _round_up(x, m):
    return ((x + m - 1) // m) * m


# ----------------------------------------------------------------------------
# In-kernel helpers
# ----------------------------------------------------------------------------
def _conv3(h, pad_ref, w_ref, bias_row):
    """'same' 3-tap conv along time as three shifted (T,C)@(C,F) MXU matmuls.

    h: (T, C) f32 value.  pad_ref: VMEM scratch (T+16, C) f32; rows [8, 8+T)
    hold h, rows [0,8) and [8+T, 16+T) are zero, so the +/-1 shifted operands
    are plain static slices (offsets 7 / 9).  w_ref: (3, C, F) bf16.
    """
    t, c = h.shape
    pad_ref[pl.ds(0, 8), :] = jnp.zeros((8, c), jnp.float32)
    pad_ref[pl.ds(8, t), :] = h
    pad_ref[pl.ds(8 + t, 8), :] = jnp.zeros((8, c), jnp.float32)
    y = jnp.dot(h.astype(jnp.bfloat16), w_ref[1],
                preferred_element_type=jnp.float32)
    y += jnp.dot(pad_ref[pl.ds(7, t), :].astype(jnp.bfloat16), w_ref[0],
                 preferred_element_type=jnp.float32)
    y += jnp.dot(pad_ref[pl.ds(9, t), :].astype(jnp.bfloat16), w_ref[2],
                 preferred_element_type=jnp.float32)
    return y + bias_row


def _layer_norm(h, gamma, beta, eps=1e-5):
    mu = jnp.mean(h, axis=-1, keepdims=True)
    var = jnp.mean(jnp.square(h - mu), axis=-1, keepdims=True)
    return (h - mu) * lax.rsqrt(var + eps) * gamma + beta


# ----------------------------------------------------------------------------
# Kernel 1: SQEmbedding.encode -> nearest codebook row (tiled over rows)
# ----------------------------------------------------------------------------
def _codebook_encode_kernel(z_ref, emb_ref, esq_ref, out_ref):
    z = z_ref[...]                                                  # (N, D) f32
    e = emb_ref[...]                                                # (M, D) f32
    # distance = 0.5*precision*(||z||^2 - 2 z.e + ||e||^2); precision and ||z||^2
    # are per-row constants and do not change the argmin, so they are dropped.
    scores = lax.dot_general(                                       # (N, M)
        z.astype(jnp.bfloat16), e.astype(jnp.bfloat16),
        (((1,), (1,)), ((), ())), preferred_element_type=jnp.float32)
    dist = esq_ref[...] - 2.0 * scores
    min_d = jnp.min(dist, axis=-1, keepdims=True)
    m = dist.shape[1]
    iota = lax.broadcasted_iota(jnp.int32, dist.shape, 1)
    idx = jnp.min(jnp.where(dist <= min_d, iota, m), axis=-1, keepdims=True)
    onehot = (iota == idx).astype(jnp.float32)
    # f32 lookup so the quantized vectors equal codebook rows exactly.
    out_ref[...] = jnp.dot(onehot, e, preferred_element_type=jnp.float32)


def run_codebook_encode(z_flat, codebook, codebook_sq, tile=256):
    n, d = z_flat.shape
    m = codebook.shape[0]
    n_pad = _round_up(n, tile)
    if n_pad != n:
        z_flat = jnp.pad(z_flat, ((0, n_pad - n), (0, 0)))
    out = pl.pallas_call(
        _codebook_encode_kernel,
        out_shape=jax.ShapeDtypeStruct((n_pad, d), jnp.float32),
        grid=(n_pad // tile,),
        in_specs=[
            pl.BlockSpec((tile, d), lambda i: (i, 0)),
            pl.BlockSpec((m, d), lambda i: (0, 0)),
            pl.BlockSpec((1, m), lambda i: (0, 0)),
        ],
        out_specs=pl.BlockSpec((tile, d), lambda i: (i, 0)),
        compiler_params=pltpu.CompilerParams(dimension_semantics=("parallel",)),
    )(z_flat, codebook, codebook_sq)
    return out[:n]


# ----------------------------------------------------------------------------
# Kernel 2: duration VariancePredictor (conv k3 -> relu -> LN -> conv -> relu
#           -> LN -> linear(->1) -> mask).  Dropout = identity (eval mode).
# ----------------------------------------------------------------------------
def _duration_kernel(zq_ref, mask_ref, live_ref,
                     w1_ref, b1_ref, g1_ref, be1_ref,
                     w2_ref, b2_ref, g2_ref, be2_ref,
                     wl_ref, bl_ref,
                     out_ref, pad1_ref, pad2_ref):
    live = live_ref[...]                                   # (T,1) 1.0 for real rows
    x = zq_ref[0] * live                                   # conv zero-pad semantics
    h = jnp.maximum(_conv3(x, pad1_ref, w1_ref, b1_ref[...]), 0.0)
    h = _layer_norm(h, g1_ref[...], be1_ref[...]) * live   # conv2 sees 0 past true end
    h = jnp.maximum(_conv3(h, pad2_ref, w2_ref, b2_ref[...]), 0.0)
    h = _layer_norm(h, g2_ref[...], be2_ref[...])
    o = jnp.dot(h, wl_ref[...], preferred_element_type=jnp.float32) + bl_ref[...]
    out_ref[0] = jnp.where(mask_ref[0] == 0.0, 0.0, o)


def run_duration_predictor(zq, mask_f, live, p):
    b, t, d = zq.shape
    f = p["w1"].shape[2]
    out = pl.pallas_call(
        _duration_kernel,
        out_shape=jax.ShapeDtypeStruct((b, t, 1), jnp.float32),
        grid=(b,),
        in_specs=[
            pl.BlockSpec((1, t, d), lambda i: (i, 0, 0)),
            pl.BlockSpec((1, t, 1), lambda i: (i, 0, 0)),
            pl.BlockSpec((t, 1), lambda i: (0, 0)),
            pl.BlockSpec((3, d, f), lambda i: (0, 0, 0)),
            pl.BlockSpec((1, f), lambda i: (0, 0)),
            pl.BlockSpec((1, f), lambda i: (0, 0)),
            pl.BlockSpec((1, f), lambda i: (0, 0)),
            pl.BlockSpec((3, f, f), lambda i: (0, 0, 0)),
            pl.BlockSpec((1, f), lambda i: (0, 0)),
            pl.BlockSpec((1, f), lambda i: (0, 0)),
            pl.BlockSpec((1, f), lambda i: (0, 0)),
            pl.BlockSpec((f, 1), lambda i: (0, 0)),
            pl.BlockSpec((1, 1), lambda i: (0, 0)),
        ],
        out_specs=pl.BlockSpec((1, t, 1), lambda i: (i, 0, 0)),
        scratch_shapes=[pltpu.VMEM((t + 16, d), jnp.float32),
                        pltpu.VMEM((t + 16, f), jnp.float32)],
        compiler_params=pltpu.CompilerParams(
            dimension_semantics=("parallel",),
            vmem_limit_bytes=64 * 1024 * 1024),
    )(zq, mask_f, live, p["w1"], p["b1"], p["g1"], p["be1"],
      p["w2"], p["b2"], p["g2"], p["be2"], p["wl"], p["bl"])
    return out[:, :, 0]


# ----------------------------------------------------------------------------
# Kernel 3 (fused mel stage): LengthRegulator gather (one-hot @ xsum on MXU)
#   + pitch predictor + energy predictor (conv1 stacked to 512-wide matmul)
#   + bucketize + fused embedding lookup + add.  One read / write of the mel
#   activation instead of 3 reads + multiple round-trips.
# ----------------------------------------------------------------------------
def _mel_stage_kernel(xsum_ref, clo_ref, chi_ref, mask_ref, live_ref,
                      w1_ref, b1_ref, g1_ref, be1_ref,
                      w2p_ref, b2p_ref, g2p_ref, be2p_ref,
                      w2e_ref, b2e_ref, g2e_ref, be2e_ref,
                      wlp_ref, blp_ref, wle_ref, ble_ref,
                      pbins_ref, ebins_ref, emb_ref,
                      out_ref, x2_ref, pp_ref, ep_ref,
                      pad1_ref, pad2_ref):
    l = out_ref.shape[1]
    f = w2p_ref.shape[1]

    # ---- LengthRegulator: LR(x)+LR(z) == LR(x+z); exact one-hot row gather ----
    l_idx = lax.broadcasted_iota(jnp.int32, (l, 1), 0)
    sel = jnp.logical_and(l_idx >= clo_ref[0], l_idx < chi_ref[0])      # (L, Tsrc)
    x2 = jnp.dot(sel.astype(jnp.float32), xsum_ref[0],
                 preferred_element_type=jnp.float32)                    # (L, D)
    x2_ref[0] = x2

    live = live_ref[...]                                                # (L, 1)
    m = mask_ref[0]                                                     # (L, 1)

    # ---- pitch & energy conv1 fused into one (L,D)@(D,2F) matmul ----
    h1 = jnp.maximum(_conv3(x2, pad1_ref, w1_ref, b1_ref[...]), 0.0)    # (L, 2F)
    g1 = g1_ref[...]
    be1 = be1_ref[...]
    hp = _layer_norm(h1[:, :f], g1[:, :f], be1[:, :f]) * live
    he = _layer_norm(h1[:, f:], g1[:, f:], be1[:, f:]) * live

    hp = jnp.maximum(_conv3(hp, pad2_ref, w2p_ref, b2p_ref[...]), 0.0)
    hp = _layer_norm(hp, g2p_ref[...], be2p_ref[...])
    pitch = jnp.dot(hp, wlp_ref[...], preferred_element_type=jnp.float32) + blp_ref[...]
    pitch = jnp.where(m == 0.0, 0.0, pitch)
    pp_ref[0] = pitch

    he = jnp.maximum(_conv3(he, pad2_ref, w2e_ref, b2e_ref[...]), 0.0)
    he = _layer_norm(he, g2e_ref[...], be2e_ref[...])
    energy = jnp.dot(he, wle_ref[...], preferred_element_type=jnp.float32) + ble_ref[...]
    energy = jnp.where(m == 0.0, 0.0, energy)
    ep_ref[0] = energy

    # ---- bucketize both + single (L, 2*NB) @ (2*NB, D) embedding matmul ----
    nb = pbins_ref.shape[1]
    pidx = jnp.sum((pbins_ref[...] < pitch).astype(jnp.int32), axis=-1, keepdims=True)
    eidx = jnp.sum((ebins_ref[...] < energy).astype(jnp.int32), axis=-1, keepdims=True)
    iota2 = lax.broadcasted_iota(jnp.int32, (l, 2 * nb), 1)
    onehot = jnp.logical_or(iota2 == pidx, iota2 == (eidx + nb)).astype(jnp.bfloat16)
    emb_add = jnp.dot(onehot, emb_ref[...], preferred_element_type=jnp.float32)
    out_ref[0] = x2 + emb_add


def run_mel_stage(xsum, clo, chi, mask_f, live, p, pbins, ebins, emb_cat, l_pad):
    b, t_src, d = xsum.shape
    f = p["w2p"].shape[1]
    f2 = p["w1"].shape[2]
    nb = pbins.shape[1]
    out_shapes = (jax.ShapeDtypeStruct((b, l_pad, d), jnp.float32),
                  jax.ShapeDtypeStruct((b, l_pad, d), jnp.float32),
                  jax.ShapeDtypeStruct((b, l_pad, 1), jnp.float32),
                  jax.ShapeDtypeStruct((b, l_pad, 1), jnp.float32))
    out_specs = (pl.BlockSpec((1, l_pad, d), lambda i: (i, 0, 0)),
                 pl.BlockSpec((1, l_pad, d), lambda i: (i, 0, 0)),
                 pl.BlockSpec((1, l_pad, 1), lambda i: (i, 0, 0)),
                 pl.BlockSpec((1, l_pad, 1), lambda i: (i, 0, 0)))
    in_specs = [
        pl.BlockSpec((1, t_src, d), lambda i: (i, 0, 0)),       # xsum = x + zq
        pl.BlockSpec((1, 1, t_src), lambda i: (i, 0, 0)),       # cumsum lo
        pl.BlockSpec((1, 1, t_src), lambda i: (i, 0, 0)),       # cumsum hi
        pl.BlockSpec((1, l_pad, 1), lambda i: (i, 0, 0)),       # mel mask
        pl.BlockSpec((l_pad, 1), lambda i: (0, 0)),             # live rows (< Lmax)
        pl.BlockSpec((3, d, f2), lambda i: (0, 0, 0)),          # w1 (pitch || energy)
        pl.BlockSpec((1, f2), lambda i: (0, 0)),                # b1
        pl.BlockSpec((1, f2), lambda i: (0, 0)),                # g1
        pl.BlockSpec((1, f2), lambda i: (0, 0)),                # be1
        pl.BlockSpec((3, f, f), lambda i: (0, 0, 0)),           # w2 pitch
        pl.BlockSpec((1, f), lambda i: (0, 0)),                 # b2 pitch
        pl.BlockSpec((1, f), lambda i: (0, 0)),                 # g2 pitch
        pl.BlockSpec((1, f), lambda i: (0, 0)),                 # be2 pitch
        pl.BlockSpec((3, f, f), lambda i: (0, 0, 0)),           # w2 energy
        pl.BlockSpec((1, f), lambda i: (0, 0)),                 # b2 energy
        pl.BlockSpec((1, f), lambda i: (0, 0)),                 # g2 energy
        pl.BlockSpec((1, f), lambda i: (0, 0)),                 # be2 energy
        pl.BlockSpec((f, 1), lambda i: (0, 0)),                 # wl pitch
        pl.BlockSpec((1, 1), lambda i: (0, 0)),                 # bl pitch
        pl.BlockSpec((f, 1), lambda i: (0, 0)),                 # wl energy
        pl.BlockSpec((1, 1), lambda i: (0, 0)),                 # bl energy
        pl.BlockSpec((1, nb), lambda i: (0, 0)),                # pitch bins
        pl.BlockSpec((1, nb), lambda i: (0, 0)),                # energy bins
        pl.BlockSpec((2 * nb, d), lambda i: (0, 0)),            # [pitch_emb; energy_emb]
    ]
    return pl.pallas_call(
        _mel_stage_kernel,
        out_shape=out_shapes,
        grid=(b,),
        in_specs=in_specs,
        out_specs=out_specs,
        scratch_shapes=[pltpu.VMEM((l_pad + 16, d), jnp.float32),
                        pltpu.VMEM((l_pad + 16, f), jnp.float32)],
        compiler_params=pltpu.CompilerParams(
            dimension_semantics=("parallel",),
            vmem_limit_bytes=64 * 1024 * 1024),
    )(xsum, clo, chi, mask_f, live,
      p["w1"], p["b1"], p["g1"], p["be1"],
      p["w2p"], p["b2p"], p["g2p"], p["be2p"],
      p["w2e"], p["b2e"], p["g2e"], p["be2e"],
      p["wlp"], p["blp"], p["wle"], p["ble"],
      pbins, ebins, emb_cat)


# ----------------------------------------------------------------------------
# Parameter init / helpers / forward
# ----------------------------------------------------------------------------
def get_mask_from_lengths_1d(lengths, max_len):
    # NOTE: `<=` (not `<`) mirrors the PyTorch helper exactly.
    ids = jnp.arange(max_len)[None, :]
    return ids <= lengths[:, None]


def _init_vp(key, d_in, f, bias_out=0.0):
    k1, k2, k3 = jax.random.split(key, 3)
    s1 = 1.0 / np.sqrt(3 * d_in)
    s2 = 1.0 / np.sqrt(3 * f)
    sl = 1.0 / np.sqrt(f)
    return dict(
        w1=(jax.random.normal(k1, (3, d_in, f), jnp.float32) * s1).astype(jnp.bfloat16),
        b1=jnp.zeros((1, f), jnp.float32),
        g1=jnp.ones((1, f), jnp.float32),
        be1=jnp.zeros((1, f), jnp.float32),
        w2=(jax.random.normal(k2, (3, f, f), jnp.float32) * s2).astype(jnp.bfloat16),
        b2=jnp.zeros((1, f), jnp.float32),
        g2=jnp.ones((1, f), jnp.float32),
        be2=jnp.zeros((1, f), jnp.float32),
        wl=jax.random.normal(k3, (f, 1), jnp.float32) * sl,
        bl=jnp.full((1, 1), bias_out, jnp.float32),
    )


def init_params(key, d_model, f=256, n_embeddings=128, n_bins=256,
                f0_min=71.0, f0_max=795.8, energy_min=0.0, energy_max=315.0):
    ks = jax.random.split(key, 6)
    dur = _init_vp(ks[1], d_model, f, bias_out=1.0)
    pitch = _init_vp(ks[2], d_model, f)
    energy = _init_vp(ks[3], d_model, f)
    mel = dict(
        # conv1 weights stacked so pitch+energy share one 512-wide MXU matmul
        w1=jnp.concatenate([pitch["w1"], energy["w1"]], axis=2),
        b1=jnp.concatenate([pitch["b1"], energy["b1"]], axis=1),
        g1=jnp.concatenate([pitch["g1"], energy["g1"]], axis=1),
        be1=jnp.concatenate([pitch["be1"], energy["be1"]], axis=1),
        w2p=pitch["w2"], b2p=pitch["b2"], g2p=pitch["g2"], be2p=pitch["be2"],
        w2e=energy["w2"], b2e=energy["b2"], g2e=energy["g2"], be2e=energy["be2"],
        wlp=pitch["wl"], blp=pitch["bl"], wle=energy["wl"], ble=energy["bl"],
    )
    codebook = jax.random.normal(ks[0], (n_embeddings, d_model), jnp.float32)
    pitch_bins = np.exp(np.linspace(np.log(f0_min), np.log(f0_max), n_bins - 1))
    energy_bins = np.linspace(energy_min, energy_max, n_bins - 1)
    # pad bin boundaries to n_bins with +inf (does not change bucket indices)
    pitch_bins = np.concatenate([pitch_bins, [np.inf]]).astype(np.float32)[None, :]
    energy_bins = np.concatenate([energy_bins, [np.inf]]).astype(np.float32)[None, :]
    pitch_emb = jax.random.normal(ks[4], (n_bins, d_model), jnp.float32) * 0.02
    energy_emb = jax.random.normal(ks[5], (n_bins, d_model), jnp.float32) * 0.02
    return dict(
        log_var_q_scalar=jnp.log(jnp.full((1,), 10.0, jnp.float32)),  # kept for parity
        codebook=codebook,
        codebook_sq=jnp.sum(codebook * codebook, axis=-1)[None, :],   # hoisted ||e||^2
        dur=dur,
        mel=mel,
        pitch_bins=jnp.asarray(pitch_bins),
        energy_bins=jnp.asarray(energy_bins),
        pe_emb=jnp.concatenate([pitch_emb, energy_emb], axis=0).astype(jnp.bfloat16),
    )


def sq_variance_adaptor_forward(params, x, src_mask, log_offset=1.0):
    """Inference forward (training=False, temperature=None)."""
    b, t_src, d = x.shape
    t_pad = _round_up(t_src, 128)
    x_p = jnp.pad(x, ((0, 0), (0, t_pad - t_src), (0, 0)))
    src_mask_f = jnp.pad(src_mask.astype(jnp.float32),
                         ((0, 0), (0, t_pad - t_src)))[:, :, None]       # (B, Tp, 1)
    live_src = (jnp.arange(t_pad) < t_src).astype(jnp.float32)[:, None]  # (Tp, 1)

    # z = x[:, :, :embedding_dim]; embedding_dim == d_model in this implementation.
    z = x_p

    # --- SQEmbedding.encode (Pallas, row-tiled) ---
    zq = run_codebook_encode(z.reshape(b * t_pad, d),
                             params["codebook"], params["codebook_sq"])
    zq = zq.reshape(b, t_pad, d)

    # --- duration predictor (Pallas) ---
    log_dur_p = run_duration_predictor(zq, src_mask_f, live_src, params["dur"])
    log_duration_prediction = log_dur_p[:, :t_src]

    # --- duration rounding + LengthRegulator index math (device) ---
    dur = jnp.maximum(jnp.round(jnp.exp(log_dur_p) - log_offset), 0.0).astype(jnp.int32)
    chi = jnp.cumsum(dur, axis=1)
    clo = chi - dur
    totals = chi[:, -1]

    # One scalar host sync picks the (128-bucketed) static padded mel length.
    # TODO(synk): a fully static max mel length would remove this sync entirely.
    l_max = max(int(jax.device_get(jnp.max(totals))), 1)
    l_pad = _round_up(l_max, 128)

    ids = jnp.arange(l_max, dtype=jnp.int32)
    mel_pos = jnp.where(ids[None, :] < totals[:, None], ids[None, :] + 1, 0)  # (B, Lmax)
    mel_mask = ids[None, :] <= mel_pos        # == torch get_mask_from_lengths(mel_pos)
    mel_mask_f = jnp.pad(mel_mask.astype(jnp.float32),
                         ((0, 0), (0, l_pad - l_max)))[:, :, None]            # (B, Lp, 1)
    live_mel = (jnp.arange(l_pad) < l_max).astype(jnp.float32)[:, None]       # (Lp, 1)

    # --- fused mel stage: LR gather + pitch/energy predictors + embeddings ---
    xsum = x_p + zq    # LR(x) + LR(z) == LR(x + z): gather once inside the kernel
    out_p, x2_p, pitch_p, energy_p = run_mel_stage(
        xsum, clo[:, None, :], chi[:, None, :], mel_mask_f, live_mel,
        params["mel"], params["pitch_bins"], params["energy_bins"],
        params["pe_emb"], l_pad)

    out = out_p[:, :l_max]
    text_dur_predicted = x2_p[:, :l_max]
    pitch_prediction = pitch_p[:, :l_max, 0]
    energy_prediction = energy_p[:, :l_max, 0]

    # TODO(synk): training path (Gumbel sampling, sq_vae loss/perplexity) not implemented.
    sq_vae_loss = None
    sq_vae_perplexity = None
    return (out, log_duration_prediction, pitch_prediction, energy_prediction,
            mel_pos, mel_mask, text_dur_predicted, sq_vae_loss, sq_vae_perplexity)


if __name__ == "__main__":
    # Small, deterministic example shapes (embedding_dim == d_model_encoder = 128).
    B, T, D = 2, 8, 128
    key = jax.random.PRNGKey(0)
    k_x, k_p = jax.random.split(key)
    x = jax.random.normal(k_x, (B, T, D), jnp.float32)
    src_lengths = jnp.array([T - 1, T - 3], jnp.int32)
    src_mask = get_mask_from_lengths_1d(src_lengths, T)                 # (B, T) bool

    params = init_params(k_p, D)

    outs = sq_variance_adaptor_forward(params, x, src_mask)
    (y, log_dur, pitch_pred, energy_pred, mel_len, mel_mask,
     text_dur_pred, _, _) = outs
    jax.block_until_ready(y)
    jax.block_until_ready(log_dur)
    jax.block_until_ready(pitch_pred)
    jax.block_until_ready(energy_pred)

    assert y.shape[0] == B and y.shape[2] == D
    assert log_dur.shape == (B, T)
    assert pitch_pred.shape == (B, y.shape[1])
    assert energy_pred.shape == (B, y.shape[1])
    assert mel_mask.shape == (B, y.shape[1])
    assert text_dur_pred.shape == y.shape
    assert bool(jnp.all(jnp.isfinite(y)))
    print("KERNEL_OK")
</pallas_src>

<mosaic_0001>
module attributes {stable_mosaic.version = 11 : i64} {
  func.func @_codebook_encode_kernel(%arg0: i32, %arg1: memref<256x128xf32, #tpu.memory_space<vmem>>, %arg2: memref<128x128xf32, #tpu.memory_space<vmem>>, %arg3: memref<1x128xf32, #tpu.memory_space<vmem>>, %arg4: memref<256x128xf32, #tpu.memory_space<vmem>>) attributes {dimension_semantics = [#tpu.dimension_semantics<parallel>], iteration_bounds = array<i64: 1>, scalar_prefetch = 0 : i64, scratch_operands = 0 : i64, tpu.core_type = #tpu.core_type<tc>, window_params = [{transform_indices = @transform_0, window_bounds = array<i64: 256, 128>}, {pipeline_mode = #tpu.pipeline_mode<synchronous>, transform_indices = @transform_1, window_bounds = array<i64: 128, 128>}, {pipeline_mode = #tpu.pipeline_mode<synchronous>, transform_indices = @transform_2, window_bounds = array<i64: 1, 128>}, {transform_indices = @transform_3, window_bounds = array<i64: 256, 128>}]} {
    %c0 = arith.constant 0 : index
    %c0_0 = arith.constant 0 : index
    %0 = vector.load %arg1[%c0, %c0_0] : memref<256x128xf32, #tpu.memory_space<vmem>>, vector<256x128xf32>
    %c0_1 = arith.constant 0 : index
    %c0_2 = arith.constant 0 : index
    %1 = vector.load %arg2[%c0_1, %c0_2] : memref<128x128xf32, #tpu.memory_space<vmem>>, vector<128x128xf32>
    %2 = arith.truncf %0 : vector<256x128xf32> to vector<256x128xbf16>
    %3 = arith.truncf %1 : vector<128x128xf32> to vector<128x128xbf16>
    %cst = arith.constant dense<0.000000e+00> : vector<256x128xf32>
    %4 = tpu.matmul %2, %3, %cst {dimension_numbers = #tpu.dot_dimension_numbers<[1], [1], [0], [0], [0, 0, 1, 0], [], []>} : vector<256x128xbf16>, vector<128x128xbf16>, vector<256x128xf32> -> vector<256x128xf32>
    %c0_3 = arith.constant 0 : index
    %c0_4 = arith.constant 0 : index
    %5 = vector.load %arg3[%c0_3, %c0_4] : memref<1x128xf32, #tpu.memory_space<vmem>>, vector<1x128xf32>
    %cst_5 = arith.constant 2.000000e+00 : f32
    %6 = vector.broadcast %cst_5 : f32 to vector<256x128xf32>
    %7 = arith.mulf %6, %4 : vector<256x128xf32>
    %8 = vector.broadcast %5 : vector<1x128xf32> to vector<256x128xf32>
    %9 = arith.subf %8, %7 : vector<256x128xf32>
    %cst_6 = arith.constant dense<0x7F800000> : vector<256xf32>
    %10 = vector.multi_reduction <minimumf>, %9, %cst_6 [1] : vector<256x128xf32> to vector<256xf32>
    %11 = vector.shape_cast %10 : vector<256xf32> to vector<256x1xf32>
    %12 = tpu.iota {dimensions = array<i32: 1>} : vector<256x128xi32>
    %13 = vector.broadcast %11 : vector<256x1xf32> to vector<256x128xf32>
    %14 = arith.cmpf ole, %9, %13 : vector<256x128xf32>
    %c128_i32 = arith.constant 128 : i32
    %15 = vector.broadcast %c128_i32 : i32 to vector<256x128xi32>
    %16 = arith.select %14, %12, %15 : vector<256x128xi1>, vector<256x128xi32>
    %cst_7 = arith.constant dense<2147483647> : vector<256xi32>
    %17 = vector.multi_reduction <minsi>, %16, %cst_7 [1] : vector<256x128xi32> to vector<256xi32>
    %18 = vector.shape_cast %17 : vector<256xi32> to vector<256x1xi32>
    %19 = vector.broadcast %18 : vector<256x1xi32> to vector<256x128xi32>
    %20 = arith.cmpi eq, %12, %19 : vector<256x128xi32>
    %21 = arith.extui %20 : vector<256x128xi1> to vector<256x128xi32>
    %22 = arith.sitofp %21 : vector<256x128xi32> to vector<256x128xf32>
    %cst_8 = arith.constant dense<0.000000e+00> : vector<256x128xf32>
    %23 = tpu.matmul %22, %1, %cst_8 {dimension_numbers = #tpu.dot_dimension_numbers<[1], [0], [0], [1], [0, 0, 1, 1], [], []>} : vector<256x128xf32>, vector<128x128xf32>, vector<256x128xf32> -> vector<256x128xf32>
    %c0_9 = arith.constant 0 : index
    %c0_10 = arith.constant 0 : index
    %24 = vector.load %arg4[%c0_9, %c0_10] : memref<256x128xf32, #tpu.memory_space<vmem>>, vector<256x128xf32>
    tpu.vector_store %arg4[%c0_9, %c0_10], %23 {strides = array<i32>} : memref<256x128xf32, #tpu.memory_space<vmem>>, vector<256x128xf32>,
    return
  }
  func.func @transform_0(%arg0: i32) -> (i32, i32) {
    %c0_i32 = arith.constant 0 : i32
    %c0_i32_0 = arith.constant 0 : i32
    return %arg0, %c0_i32 : i32, i32
  }
  func.func @transform_1(%arg0: i32) -> (i32, i32) {
    %c0_i32 = arith.constant 0 : i32
    %c0_i32_0 = arith.constant 0 : i32
    %c0_i32_1 = arith.constant 0 : i32
    return %c0_i32, %c0_i32_0 : i32, i32
  }
  func.func @transform_2(%arg0: i32) -> (i32, i32) {
    %c0_i32 = arith.constant 0 : i32
    %c0_i32_0 = arith.constant 0 : i32
    %c0_i32_1 = arith.constant 0 : i32
    return %c0_i32, %c0_i32_0 : i32, i32
  }
  func.func @transform_3(%arg0: i32) -> (i32, i32) {
    %c0_i32 = arith.constant 0 : i32
    %c0_i32_0 = arith.constant 0 : i32
    return %arg0, %c0_i32 : i32, i32
  }
}

</mosaic_0001>

<bundles_post_ra>
// kernel: tpu_custom_call.1
= control target key start
LH: loop header
LB: loop body
LE: loop exit
PB: predicated region body
PF: predicated region fallthrough
CT: control target
= control target key end

     0   :  { %8 = vsyncpa [#allocation3], 0  ;;  %s2006_s0 = inlined_call_operand.hbm [shape: f32[256,128], index: 0, kind: input, shape index: {}]   ;;  %s2007_s1 = inlined_call_operand.hbm [shape: f32[128,128], index: 1, kind: input, shape index: {}]   ;;  %s2008_s2 = inlined_call_operand.vmem [shape: f32[1,128], index: 2, kind: input, shape index: {}]   ;;  %s2009_s3 = inlined_call_operand.hbm [shape: f32[256,128], index: 3, kind: output, shape index: {}]  }
   0x1   :  { %9 = vsyncpa [#allocation6], 0 }
   0x2   :  { %10 = vsyncpa [#allocation4], 0  ;;  %s15_s14 = sshll.u32 %s2006_s0, 4  ;;  %s1288_s15 = smov [#allocation2]   ;;  %s16_s14 = int_to_ptr.hbm [resolvable:$true] %s15_s14 }
   0x3   :  { %s17_s16 = sshll.u32 %s1288_s15, 4  ;;  %s28_s19 = sshll.u32 %s2007_s1, 4  ;;  %s18_s16 = int_to_ptr.vmem [resolvable:$true] %s17_s16  ;;  %s29_s19 = int_to_ptr.hbm [resolvable:$true] %s28_s19 }
   0x4   :  { %s1289_s20 = smov 128   ;;  %s1290_s21 = smov 8  }
   0x5   :  { %23 = dma.hbm_to_vmem [thread:$0]  %s16_s14, 4096, %s18_s16, [#allocation3], %s1289_s20, %s1289_s20, %s1290_s21  }
   0x6   :  { %s1291_s22 = smov [#allocation5]  }
   0x7   :  { %s30_s23 = sshll.u32 %s1291_s22, 4  ;;  %s31_s23 = int_to_ptr.vmem [resolvable:$true] %s30_s23 }
   0x8   :  { %36 = dma.hbm_to_vmem [thread:$0]  %s29_s19, 2048, %s31_s23, [#allocation6], %s1289_s20, %s1289_s20, %s1290_s21  }
   0x9   :  { %1282 = dma.done.wait [#allocation3], 4096  }
   0xa   :  { %1283 = vsyncadd [#allocation3], 4294963200 }
   0xb   :  { %1284 = dma.done.wait [#allocation6], 2048  }
   0xc   :  { %1285 = vsyncadd [#allocation6], 4294965248  ;;  %v93_v0 = vld [vmem:[#allocation5 + $0x70] sm:$0xff]  ;;  %v94_v1 = vld [vmem:[#allocation5 + $0x78] sm:$0xff]  ;;  %s1101_s27 = sshll.u32 %s2009_s3, 4  ;;  %s1102_s27 = int_to_ptr.hbm [resolvable:$true] %s1101_s27 }
   0xd   :  { %v118_v2 = vpack.c.bf16 %v94_v1, %v93_v0  ;;  %950 = vmatpush.msra.mxu1 %v94_v1  ;;  %1187 = vmatpush.msra.mxu3 %v94_v1  ;;  %v91_v3 = vld [vmem:[#allocation5 + $0x60] sm:$0xff]  ;;  %v92_v4 = vld [vmem:[#allocation5 + $0x68] sm:$0xff]  ;;  %v90_v6 = vld [vmem:[#allocation5 + $0x58] sm:$0xff] }
   0xe   :  { %v117_v5 = vpack.c.bf16 %v92_v4, %v91_v3  ;;  %v89_v7 = vld [vmem:[#allocation5 + $0x50] sm:$0xff]  ;;  %v88_v8 = vld [vmem:[#allocation5 + $0x48] sm:$0xff]  ;;  %v87_v10 = vld [vmem:[#allocation5 + $0x40] sm:$0xff] }
   0xf   :  { %119 = vmatpush.bf16.xpose.msra.mxu0 %v118_v2  ;;  %1179 = vmatpush.bf16.xpose.msra.mxu2 %v118_v2  ;;  %v116_v9 = vpack.c.bf16 %v90_v6, %v89_v7  ;;  %v86_v11 = vld [vmem:[#allocation5 + $0x38] sm:$0xff]  ;;  %v85_v12 = vld [vmem:[#allocation5 + $0x30] sm:$0xff]  ;;  %v84_v13 = vld [vmem:[#allocation5 + $0x28] sm:$0xff]  ;;  %v115_v14 = vpack.c.bf16 %v88_v8, %v87_v10 }
  0x10   :  { %951 = vmatpush.msra.mxu1 %v93_v0  ;;  %1188 = vmatpush.msra.mxu3 %v93_v0  ;;  %v83_v15 = vld [vmem:[#allocation5 + $0x20] sm:$0xff]  ;;  %v82_v16 = vld [vmem:[#allocation5 + $0x18] sm:$0xff]  ;;  %v81_v17 = vld [vmem:[#allocation5 + $0x10] sm:$0xff]  ;;  %v114_v19 = vpack.c.bf16 %v86_v11, %v85_v12 }
  0x11   :  { %v80_v18 = vld [vmem:[#allocation5 + $0x8] sm:$0xff]  ;;  %v79_v20 = vld [vmem:[#allocation5] sm:$0xff]  ;;  %v113_v21 = vpack.c.bf16 %v84_v13, %v83_v15  ;;  %v112_v22 = vpack.c.bf16 %v82_v16, %v81_v17  ;;  %v61_v26 = vld [vmem:[#allocation2 + $0x70] sm:$0xff] }
  0x12   :  { %952 = vmatpush.msra.mxu1 %v92_v4  ;;  %1189 = vmatpush.msra.mxu3 %v92_v4  ;;  %v111_v23 = vpack.c.bf16 %v80_v18, %v79_v20  ;;  %v47_v24 = vld [vmem:[#allocation2] sm:$0xff]  ;;  %v48_v25 = vld [vmem:[#allocation2 + $0x8] sm:$0xff]  ;;  %v62_v27 = vld [vmem:[#allocation2 + $0x78] sm:$0xff] }
  0x13   :  { %v95_v28 = vpack.c.bf16 %v48_v25, %v47_v24  ;;  %v102_v29 = vpack.c.bf16 %v62_v27, %v61_v26  ;;  %v49_v30 = vld [vmem:[#allocation2 + $0x10] sm:$0xff]  ;;  %v50_v31 = vld [vmem:[#allocation2 + $0x18] sm:$0xff]  ;;  %v63_v32 = vld [vmem:[#allocation2 + $0x80] sm:$0xff] }
  0x14   :  { %953 = vmatpush.msra.mxu1 %v91_v3  ;;  %1190 = vmatpush.msra.mxu3 %v91_v3  ;;  %v64_v33 = vld [vmem:[#allocation2 + $0x88] sm:$0xff]  ;;  %v96_v34 = vpack.c.bf16 %v50_v31, %v49_v30  ;;  %v51_v36 = vld [vmem:[#allocation2 + $0x20] sm:$0xff]  ;;  %v65_v38 = vld [vmem:[#allocation2 + $0x90] sm:$0xff] }
  0x15   :  { %v103_v35 = vpack.c.bf16 %v64_v33, %v63_v32  ;;  %v52_v37 = vld [vmem:[#allocation2 + $0x28] sm:$0xff]  ;;  %v66_v39 = vld [vmem:[#allocation2 + $0x98] sm:$0xff]  ;;  %v53_v42 = vld [vmem:[#allocation2 + $0x30] sm:$0xff] }
  0x16   :  { %954 = vmatpush.msra.mxu1 %v90_v6  ;;  %1191 = vmatpush.msra.mxu3 %v90_v6  ;;  %v97_v40 = vpack.c.bf16 %v52_v37, %v51_v36  ;;  %v104_v41 = vpack.c.bf16 %v66_v39, %v65_v38  ;;  %v54_v43 = vld [vmem:[#allocation2 + $0x38] sm:$0xff]  ;;  %v67_v44 = vld [vmem:[#allocation2 + $0xa0] sm:$0xff]  ;;  %v68_v45 = vld [vmem:[#allocation2 + $0xa8] sm:$0xff] }
  0x17   :  { %120 = vmatpush.bf16.xpose.msra.mxu0 %v117_v5  ;;  %1180 = vmatpush.bf16.xpose.msra.mxu2 %v117_v5  ;;  %v98_v46 = vpack.c.bf16 %v54_v43, %v53_v42  ;;  %v105_v47 = vpack.c.bf16 %v68_v45, %v67_v44  ;;  %v55_v48 = vld [vmem:[#allocation2 + $0x40] sm:$0xff]  ;;  %v56_v49 = vld [vmem:[#allocation2 + $0x48] sm:$0xff]  ;;  %v69_v50 = vld [vmem:[#allocation2 + $0xb0] sm:$0xff] }
  0x18   :  { %955 = vmatpush.msra.mxu1 %v89_v7  ;;  %1192 = vmatpush.msra.mxu3 %v89_v7  ;;  %v70_v51 = vld [vmem:[#allocation2 + $0xb8] sm:$0xff]  ;;  %v99_v52 = vpack.c.bf16 %v56_v49, %v55_v48  ;;  %v57_v54 = vld [vmem:[#allocation2 + $0x50] sm:$0xff]  ;;  %v71_v56 = vld [vmem:[#allocation2 + $0xc0] sm:$0xff] }
  0x19   :  { %v106_v53 = vpack.c.bf16 %v70_v51, %v69_v50  ;;  %v58_v55 = vld [vmem:[#allocation2 + $0x58] sm:$0xff]  ;;  %v72_v57 = vld [vmem:[#allocation2 + $0xc8] sm:$0xff]  ;;  %v59_v60 = vld [vmem:[#allocation2 + $0x60] sm:$0xff] }
  0x1a   :  { %956 = vmatpush.msra.mxu1 %v88_v8  ;;  %1193 = vmatpush.msra.mxu3 %v88_v8  ;;  %v100_v58 = vpack.c.bf16 %v58_v55, %v57_v54  ;;  %v107_v59 = vpack.c.bf16 %v72_v57, %v71_v56  ;;  %v60_v61 = vld [vmem:[#allocation2 + $0x68] sm:$0xff]  ;;  %v73_v62 = vld [vmem:[#allocation2 + $0xd0] sm:$0xff]  ;;  %v74_v63 = vld [vmem:[#allocation2 + $0xd8] sm:$0xff] }
  0x1b   :  { %v101_v0 = vpack.c.bf16 %v60_v61, %v59_v60  ;;  %v108_v1 = vpack.c.bf16 %v74_v63, %v73_v62  ;;  %v75_v2 = vld [vmem:[#allocation2 + $0xe0] sm:$0xff]  ;;  %v76_v3 = vld [vmem:[#allocation2 + $0xe8] sm:$0xff]  ;;  %v77_v5 = vld [vmem:[#allocation2 + $0xf0] sm:$0xff] }
  0x1c   :  { %957 = vmatpush.msra.mxu1 %v87_v10  ;;  %1194 = vmatpush.msra.mxu3 %v87_v10  ;;  %v109_v4 = vpack.c.bf16 %v76_v3, %v75_v2  ;;  %v78_v6 = vld [vmem:[#allocation2 + $0xf8] sm:$0xff]  ;;  %v1329_v7 = vld [vmem:[%s2008_s2] ss:$0 sm:$0xff]  ;;  %s1293_s2 = smov [#allocation7]  }
  0x1d   :  { %v110_v8 = vpack.c.bf16 %v78_v6, %v77_v5  ;;  %s1099_s24 = sshll.u32 %s1293_s2, 4  ;;  %s1100_s24 = int_to_ptr.vmem [resolvable:$true] %s1099_s24 }
  0x1e   :  { %958 = vmatpush.msra.mxu1 %v86_v11  ;;  %1195 = vmatpush.msra.mxu3 %v86_v11 }
  0x1f   :  { %121 = vmatpush.bf16.xpose.msra.mxu0 %v116_v9  ;;  %1181 = vmatpush.bf16.xpose.msra.mxu2 %v116_v9 }
  0x20   :  { %959 = vmatpush.msra.mxu1 %v85_v12  ;;  %1196 = vmatpush.msra.mxu3 %v85_v12 }
  0x22   :  { %960 = vmatpush.msra.mxu1 %v84_v13  ;;  %1197 = vmatpush.msra.mxu3 %v84_v13 }
  0x24   :  { %961 = vmatpush.msra.mxu1 %v83_v15  ;;  %1198 = vmatpush.msra.mxu3 %v83_v15 }
  0x26   :  { %962 = vmatpush.msra.mxu1 %v82_v16  ;;  %1199 = vmatpush.msra.mxu3 %v82_v16 }
  0x27   :  { %122 = vmatpush.bf16.xpose.msra.mxu0 %v115_v14  ;;  %1182 = vmatpush.bf16.xpose.msra.mxu2 %v115_v14 }
  0x28   :  { %963 = vmatpush.msra.mxu1 %v81_v17  ;;  %1200 = vmatpush.msra.mxu3 %v81_v17 }
  0x2a   :  { %964 = vmatpush.msra.mxu1 %v80_v18  ;;  %1201 = vmatpush.msra.mxu3 %v80_v18 }
  0x2c   :  { %965 = vmatpush.msra.mxu1 %v79_v20  ;;  %1202 = vmatpush.msra.mxu3 %v79_v20 }
  0x2f   :  { %123 = vmatpush.bf16.xpose.msra.mxu0 %v114_v19  ;;  %1183 = vmatpush.bf16.xpose.msra.mxu2 %v114_v19 }
  0x37   :  { %124 = vmatpush.bf16.xpose.msra.mxu0 %v113_v21  ;;  %1184 = vmatpush.bf16.xpose.msra.mxu2 %v113_v21 }
  0x3f   :  { %125 = vmatpush.bf16.xpose.msra.mxu0 %v112_v22  ;;  %1185 = vmatpush.bf16.xpose.msra.mxu2 %v112_v22 }
  0x47   :  { %126 = vmatpush.bf16.xpose.msra.mxu0 %v111_v23  ;;  %1186 = vmatpush.bf16.xpose.msra.mxu2 %v111_v23 }
  0x4e   :  { %127 = vmatmul.bf16.vlgmr.msra.gmra.mxu0 %v95_v28  ;;  %162 = vmatmul.bf16.vlgmr.msra.gmra.mxu2 %v102_v29 }
  0x5e   :  { %132 = vmatmul.bf16.gmra.mxu0 %v96_v34  ;;  %167 = vmatmul.bf16.gmra.mxu2 %v103_v35 }
  0x6e   :  { %137 = vmatmul.bf16.gmra.mxu0 %v97_v40  ;;  %172 = vmatmul.bf16.gmra.mxu2 %v104_v41 }
  0x7e   :  { %142 = vmatmul.bf16.gmra.mxu0 %v98_v46  ;;  %177 = vmatmul.bf16.gmra.mxu2 %v105_v47 }
  0x8e   :  { %147 = vmatmul.bf16.gmra.mxu0 %v99_v52  ;;  %182 = vmatmul.bf16.gmra.mxu2 %v106_v53 }
  0x9e   :  { %152 = vmatmul.bf16.gmra.mxu0 %v100_v58  ;;  %187 = vmatmul.bf16.gmra.mxu2 %v107_v59 }
  0xae   :  { %157 = vmatmul.bf16.gmra.mxu0 %v101_v0  ;;  %192 = vmatmul.bf16.gmra.mxu2 %v108_v1 }
  0xbe   :  { %197 = vmatmul.bf16.gmra.mxu2 %v109_v4 }
  0xcb   :  { %v128_v9 = vpop.f32.mrf.mxu0 }
  0xcc   :  { %v209_v10 = vmul.f32 2.0, %v128_v9 }
  0xce   :  { %v1332_v11 = vsub.f32 %v1329_v7, %v209_v10  ;;  %202 = vmatmul.bf16.gmra.mxu2 %v110_v8 }
  0xd0   :  { %276 = vmin.xlane.f32.xlu0 %v1332_v11 }
  0xd1   :  { %v163_v12 = vpop.f32.mrf.mxu2 }
  0xd2   :  { %v223_v13 = vmul.f32 2.0, %v163_v12 }
  0xd3   :  { %v130_v14 = vpop.f32.mrf.mxu0 }
  0xd4   :  { %v1336_v15 = vsub.f32 %v1329_v7, %v223_v13  ;;  %v210_v17 = vmul.f32 2.0, %v130_v14 }
  0xd6   :  { %v1340_v20 = vsub.f32 %v1329_v7, %v210_v17 }
  0xd8   :  { %304 = vmin.xlane.f32.xlu0 %v1336_v15 }
  0xd9   :  { %v165_v16 = vpop.f32.mrf.mxu2 }
  0xda   :  { %v224_v23 = vmul.f32 2.0, %v165_v16 }
  0xdb   :  { %v133_v18 = vpop.f32.mrf.mxu0 }
  0xdc   :  { %v211_v19 = vmul.f32 2.0, %v133_v18  ;;  %v1350_v26 = vsub.f32 %v1329_v7, %v224_v23 }
  0xde   :  { %v1343_v21 = vsub.f32 %v1329_v7, %v211_v19 }
  0xe0   :  { %278 = vmin.xlane.f32.xlu0 %v1340_v20  ;;  %280 = vmin.xlane.f32.xlu1 %v1343_v21 }
  0xe1   :  { %v1347_v22 = vpop.f32.mrf.mxu2 }
  0xe3   :  { %v135_v24 = vpop.f32.mrf.mxu0 }
  0xe4   :  { %v212_v25 = vmul.f32 2.0, %v135_v24 }
  0xe6   :  { %v1353_v27 = vsub.f32 %v1329_v7, %v212_v25 }
  0xe8   :  { %306 = vmin.xlane.f32.xlu0 %v1350_v26  ;;  %282 = vmin.xlane.f32.xlu1 %v1353_v27 }
  0xe9   :  { %v1357_v28 = vpop.f32.mrf.mxu2 }
  0xeb   :  { %v138_v29 = vpop.f32.mrf.mxu0 }
  0xec   :  { %v213_v30 = vmul.f32 2.0, %v138_v29 }
  0xee   :  { %v1360_v31 = vsub.f32 %v1329_v7, %v213_v30 }
  0xf0   :  { %284 = vmin.xlane.f32.xlu2 %v1360_v31 }
  0xf1   :  { %v173_v32 = vpop.f32.mrf.mxu2 }
  0xf2   :  { %v227_v33 = vmul.f32 2.0, %v173_v32 }
  0xf3   :  { %v140_v34 = vpop.f32.mrf.mxu0 }
  0xf4   :  { %v214_v35 = vmul.f32 2.0, %v140_v34  ;;  %v1364_v36 = vsub.f32 %v1329_v7, %v227_v33 }
  0xf6   :  { %v1367_v37 = vsub.f32 %v1329_v7, %v214_v35  ;;  %v340_v35 = vlaneseq }
  0xf8   :  { %312 = vmin.xlane.f32.xlu2 %v1364_v36  ;;  %286 = vmin.xlane.f32.xlu1 %v1367_v37 }
  0xf9   :  { %v175_v38 = vpop.f32.mrf.mxu2 }
  0xfa   :  { %v228_v39 = vmul.f32 2.0, %v175_v38 }
  0xfb   :  { %v143_v40 = vpop.f32.mrf.mxu0 }
  0xfc   :  { %v215_v41 = vmul.f32 2.0, %v143_v40  ;;  %v1372_v42 = vsub.f32 %v1329_v7, %v228_v39  ;;  %v1439_v39 = vand.u32 127, %v340_v35 }
  0xfe   :  { %314 = vmin.xlane.f32.xlu0 %v1372_v42  ;;  %v1376_v43 = vsub.f32 %v1329_v7, %v215_v41 }
 0x100   :  { %288 = vmin.xlane.f32.xlu1 %v1376_v43 }
 0x101   :  { %v178_v44 = vpop.f32.mrf.mxu2 }
 0x102   :  { %v229_v45 = vmul.f32 2.0, %v178_v44 }
 0x103   :  { %v145_v46 = vpop.f32.mrf.mxu0 }
 0x104   :  { %v216_v47 = vmul.f32 2.0, %v145_v46  ;;  %v1380_v48 = vsub.f32 %v1329_v7, %v229_v45 }
 0x106   :  { %316 = vmin.xlane.f32.xlu2 %v1380_v48  ;;  %v1384_v49 = vsub.f32 %v1329_v7, %v216_v47 }
 0x108   :  { %290 = vmin.xlane.f32.xlu1 %v1384_v49 }
 0x109   :  { %v180_v50 = vpop.f32.mrf.mxu2 }
 0x10a   :  { %v230_v51 = vmul.f32 2.0, %v180_v50 }
 0x10b   :  { %v148_v52 = vpop.f32.mrf.mxu0 }
 0x10c   :  { %v217_v53 = vmul.f32 2.0, %v148_v52  ;;  %v1388_v54 = vsub.f32 %v1329_v7, %v230_v51 }
 0x10e   :  { %318 = vmin.xlane.f32.xlu2 %v1388_v54  ;;  %v1392_v55 = vsub.f32 %v1329_v7, %v217_v53 }
 0x110   :  { %292 = vmin.xlane.f32.xlu1 %v1392_v55 }
 0x111   :  { %v183_v56 = vpop.f32.mrf.mxu2 }
 0x112   :  { %v231_v57 = vmul.f32 2.0, %v183_v56 }
 0x113   :  { %v150_v58 = vpop.f32.mrf.mxu0 }
 0x114   :  { %v218_v59 = vmul.f32 2.0, %v150_v58  ;;  %v1396_v60 = vsub.f32 %v1329_v7, %v231_v57 }
 0x116   :  { %320 = vmin.xlane.f32.xlu2 %v1396_v60  ;;  %v1400_v61 = vsub.f32 %v1329_v7, %v218_v59 }
 0x118   :  { %294 = vmin.xlane.f32.xlu1 %v1400_v61 }
 0x119   :  { %v185_v62 = vpop.f32.mrf.mxu2 }
 0x11a   :  { %v232_v63 = vmul.f32 2.0, %v185_v62 }
 0x11b   :  { %v153_v0 = vpop.f32.mrf.mxu0 }
 0x11c   :  { %v1404_v1 = vsub.f32 %v1329_v7, %v232_v63  ;;  %v219_v2 = vmul.f32 2.0, %v153_v0 }
 0x11e   :  { %322 = vmin.xlane.f32.xlu2 %v1404_v1  ;;  %v1408_v5 = vsub.f32 %v1329_v7, %v219_v2 }
 0x121   :  { %v188_v3 = vpop.f32.mrf.mxu2 }
 0x122   :  { %v233_v4 = vmul.f32 2.0, %v188_v3 }
 0x123   :  { %v155_v6 = vpop.f32.mrf.mxu0 }
 0x124   :  { %v1411_v8 = vsub.f32 %v1329_v7, %v233_v4  ;;  %v220_v9 = vmul.f32 2.0, %v155_v6 }
 0x126   :  { %324 = vmin.xlane.f32.xlu0 %v1411_v8  ;;  %296 = vmin.xlane.f32.xlu2 %v1408_v5  ;;  %v1416_v13 = vsub.f32 %v1329_v7, %v220_v9 }
 0x129   :  { %v190_v10 = vpop.f32.mrf.mxu2 }
 0x12a   :  { %v234_v12 = vmul.f32 2.0, %v190_v10 }
 0x12b   :  { %v158_v14 = vpop.f32.mrf.mxu0 }
 0x12c   :  { %v221_v16 = vmul.f32 2.0, %v158_v14  ;;  %v1419_v17 = vsub.f32 %v1329_v7, %v234_v12 }
 0x12e   :  { %326 = vmin.xlane.f32.xlu1 %v1419_v17  ;;  %298 = vmin.xlane.f32.xlu0 %v1416_v13  ;;  %v1424_v18 = vsub.f32 %v1329_v7, %v221_v16 }
 0x130   :  { %300 = vmin.xlane.f32.xlu2 %v1424_v18 }
 0x131   :  { %v193_v19 = vpop.f32.mrf.mxu2 }
 0x132   :  { %v235_v23 = vmul.f32 2.0, %v193_v19 }
 0x133   :  { %v160_v24 = vpop.f32.mrf.mxu0 }
 0x134   :  { %v222_v25 = vmul.f32 2.0, %v160_v24  ;;  %v1428_v29 = vsub.f32 %v1329_v7, %v235_v23 }
 0x136   :  { %328 = vmin.xlane.f32.xlu0 %v1428_v29  ;;  %v1432_v30 = vsub.f32 %v1329_v7, %v222_v25 }
 0x138   :  { %302 = vmin.xlane.f32.xlu1 %v1432_v30 }
 0x139   :  { %v195_v32 = vpop.f32.mrf.mxu2 }
 0x13a   :  { %v236_v33 = vmul.f32 2.0, %v195_v32 }
 0x13c   :  { %v1436_v34 = vsub.f32 %v1329_v7, %v236_v33 }
 0x13e   :  { %330 = vmin.xlane.f32.xlu2 %v1436_v34 }
 0x141   :  { %v198_v38 = vpop.f32.mrf.mxu2 }
 0x142   :  { %v237_v40 = vmul.f32 2.0, %v198_v38 }
 0x143   :  { %v277_v41 = vpop.xlane.xlu0 %276 }
 0x144   :  { %vm342_vm0 = vcmp.le.f32.partialorder %v1332_v11, %v277_v41  ;;  %v1443_v44 = vsub.f32 %v1329_v7, %v237_v40 }
 0x145   :  { %v1446_v45 = vsel %vm342_vm0, %v1439_v39, 128 }
 0x146   :  { %332 = vmin.xlane.f32.xlu1 %v1443_v44  ;;  %v407_v46 = vshra.s32 %v1446_v45, 16 }
 0x148   :  { %v1450_v47 = vcvt.s32.f32 %v407_v46 }
 0x149   :  { %v200_v50 = vpop.f32.mrf.mxu2 }
 0x14a   :  { %410 = vmin.xlane.f32.xlu0 %v1450_v47  ;;  %v238_v52 = vmul.f32 2.0, %v200_v50 }
 0x14b   :  { %v1453_v51 = vpop.xlane.xlu0 %304 }
 0x14c   :  { %v1456_v11 = vsub.f32 %v1329_v7, %v238_v52 }
 0x151   :  { %v203_v62 = vpop.f32.mrf.mxu2 }
 0x152   :  { %334 = vmin.xlane.f32.xlu0 %v1456_v11  ;;  %v239_v63 = vmul.f32 2.0, %v203_v62 }
 0x153   :  { %v279_v53 = vpop.xlane.xlu0 %278  ;;  %v281_v59 = vpop.xlane.xlu1 %280 }
 0x154   :  { %vm343_vm1 = vcmp.le.f32.partialorder %v1340_v20, %v279_v53  ;;  %vm344_vm2 = vcmp.le.f32.partialorder %v1343_v21, %v281_v59  ;;  %v1469_v0 = vsub.f32 %v1329_v7, %v239_v63 }
 0x155   :  { %v1461_v56 = vsel %vm343_vm1, %v1439_v39, 128  ;;  %v1472_v2 = vsel %vm344_vm2, %v1439_v39, 128 }
 0x156   :  { %v421_v57 = vshra.s32 %v1461_v56, 16  ;;  %v435_v4 = vshra.s32 %v1472_v2, 16 }
 0x158   :  { %v1464_v58 = vcvt.s32.f32 %v421_v57  ;;  %v1482_v9 = vcvt.s32.f32 %v435_v4 }
 0x15a   :  { %424 = vmin.xlane.f32.xlu0 %v1464_v58 }
 0x15b   :  { %v283_v20 = vpop.xlane.xlu1 %282  ;;  %v1486_v12 = vpop.xlane.xlu0 %306 }
 0x15c   :  { %vm345_vm4 = vcmp.le.f32.partialorder %v1353_v27, %v283_v20 }
 0x15d   :  { %v1489_v14 = vsel %vm345_vm4, %v1439_v39, 128 }
 0x15e   :  { %v449_v27 = vshra.s32 %v1489_v14, 16 }
 0x160   :  { %v1500_v24 = vcvt.s32.f32 %v449_v27 }
 0x162   :  { %336 = vmin.xlane.f32.xlu0 %v1469_v0 }
 0x163   :  { %v285_v3 = vpop.xlane.xlu2 %284 }
 0x164   :  { %vm346_vm3 = vcmp.le.f32.partialorder %v1360_v31, %v285_v3 }
 0x165   :  { %v1478_v6 = vsel %vm346_vm3, %v1439_v39, 128 }
 0x166   :  { %v463_v21 = vshra.s32 %v1478_v6, 16 }
 0x168   :  { %v1484_v10 = vcvt.s32.f32 %v463_v21 }
 0x16a   :  { %438 = vmin.xlane.f32.xlu0 %v1482_v9  ;;  %466 = vmin.xlane.f32.xlu1 %v1484_v10 }
 0x16b   :  { %v313_v31 = vpop.xlane.xlu2 %312  ;;  %v287_v16 = vpop.xlane.xlu1 %286 }
 0x16c   :  { %vm360_vm5 = vcmp.le.f32.partialorder %v1364_v36, %v313_v31  ;;  %vm347_vm6 = vcmp.le.f32.partialorder %v1367_v37, %v287_v16 }
 0x16d   :  { %v1496_v19 = vsel %vm360_vm5, %v1439_v39, 128  ;;  %v1505_v32 = vsel %vm347_vm6, %v1439_v39, 128 }
 0x16e   :  { %v659_v23 = vshra.s32 %v1496_v19, 16  ;;  %v477_v38 = vshra.s32 %v1505_v32, 16 }
 0x170   :  { %v1502_v25 = vcvt.s32.f32 %v659_v23  ;;  %v1522_v46 = vcvt.s32.f32 %v477_v38 }
 0x171   :  { %v315_v33 = vpop.xlane.xlu0 %314 }
 0x172   :  { %vm361_vm7 = vcmp.le.f32.partialorder %v1372_v42, %v315_v33  ;;  %452 = vmin.xlane.f32.xlu0 %v1500_v24  ;;  %662 = vmin.xlane.f32.xlu2 %v1502_v25 }
 0x173   :  { %v1511_v36 = vsel %vm361_vm7, %v1439_v39, 128  ;;  %v289_v37 = vpop.xlane.xlu1 %288 }
 0x174   :  { %vm348_vm8 = vcmp.le.f32.partialorder %v1376_v43, %v289_v37  ;;  %v673_v35 = vshra.s32 %v1511_v36, 16 }
 0x175   :  { %v1517_v40 = vsel %vm348_vm8, %v1439_v39, 128 }
 0x176   :  { %v491_v41 = vshra.s32 %v1517_v40, 16  ;;  %v1520_v42 = vcvt.s32.f32 %v673_v35 }
 0x178   :  { %v1524_v50 = vcvt.s32.f32 %v491_v41 }
 0x179   :  { %v317_v52 = vpop.xlane.xlu2 %316 }
 0x17a   :  { %vm362_vm9 = vcmp.le.f32.partialorder %v1380_v48, %v317_v52  ;;  %676 = vmin.xlane.f32.xlu0 %v1520_v42  ;;  %480 = vmin.xlane.f32.xlu2 %v1522_v46 }
 0x17b   :  { %v1530_v43 = vsel %vm362_vm9, %v1439_v39, 128  ;;  %494 = vmin.xlane.f32.xlu1 %v1524_v50  ;;  %v291_v53 = vpop.xlane.xlu1 %290 }
 0x17c   :  { %vm349_vm10 = vcmp.le.f32.partialorder %v1384_v49, %v291_v53  ;;  %v687_v57 = vshra.s32 %v1530_v43, 16 }
 0x17d   :  { %v1536_v59 = vsel %vm349_vm10, %v1439_v39, 128 }
 0x17e   :  { %v505_v62 = vshra.s32 %v1536_v59, 16  ;;  %v1541_v63 = vcvt.s32.f32 %v687_v57 }
 0x180   :  { %v1539_v48 = vcvt.s32.f32 %v505_v62 }
 0x181   :  { %v319_v20 = vpop.xlane.xlu2 %318 }
 0x182   :  { %vm363_vm11 = vcmp.le.f32.partialorder %v1388_v54, %v319_v20  ;;  %508 = vmin.xlane.f32.xlu0 %v1539_v48  ;;  %690 = vmin.xlane.f32.xlu2 %v1541_v63 }
 0x183   :  { %v1547_v49 = vsel %vm363_vm11, %v1439_v39, 128  ;;  %v293_v3 = vpop.xlane.xlu1 %292 }
 0x184   :  { %vm350_vm12 = vcmp.le.f32.partialorder %v1392_v55, %v293_v3  ;;  %v701_v4 = vshra.s32 %v1547_v49, 16 }
 0x185   :  { %v1552_v21 = vsel %vm350_vm12, %v1439_v39, 128 }
 0x186   :  { %v1554_v31 = vcvt.s32.f32 %v701_v4  ;;  %v519_v16 = vshra.s32 %v1552_v21, 16 }
 0x188   :  { %704 = vmin.xlane.f32.xlu1 %v1554_v31  ;;  %v1558_v54 = vcvt.s32.f32 %v519_v16 }
 0x189   :  { %v321_v27 = vpop.xlane.xlu2 %320 }
 0x18a   :  { %vm364_vm13 = vcmp.le.f32.partialorder %v1396_v60, %v321_v27  ;;  %522 = vmin.xlane.f32.xlu2 %v1558_v54 }
 0x18b   :  { %v1563_v55 = vsel %vm364_vm13, %v1439_v39, 128  ;;  %v295_v23 = vpop.xlane.xlu1 %294 }
 0x18c   :  { %vm351_vm14 = vcmp.le.f32.partialorder %v1400_v61, %v295_v23  ;;  %v715_v33 = vshra.s32 %v1563_v55, 16 }
 0x18d   :  { %v1568_v37 = vsel %vm351_vm14, %v1439_v39, 128  ;;  %vm356_vm14 = vcmp.le.f32.partialorder %v1336_v15, %v1453_v51 }
 0x18e   :  { %v1570_v35 = vcvt.s32.f32 %v715_v33  ;;  %v533_v38 = vshra.s32 %v1568_v37, 16  ;;  %v406_v33 = vand.u32 65535, %v1446_v45 }
 0x190   :  { %718 = vmin.xlane.f32.xlu0 %v1570_v35  ;;  %v1574_v60 = vcvt.s32.f32 %v533_v38 }
 0x191   :  { %v323_v41 = vpop.xlane.xlu2 %322 }
 0x192   :  { %vm365_vm15 = vcmp.le.f32.partialorder %v1404_v1, %v323_v41  ;;  %536 = vmin.xlane.f32.xlu2 %v1574_v60  ;;  %v408_v41 = vcvt.s32.f32 %v406_v33 }
 0x193   :  { %v1579_v61 = vsel %vm365_vm15, %v1439_v39, 128 }
 0x194   :  { %v729_v52 = vshra.s32 %v1579_v61, 16 }
 0x196   :  { %v1582_v53 = vcvt.s32.f32 %v729_v52 }
 0x199   :  { %v297_v57 = vpop.xlane.xlu2 %296  ;;  %v325_v62 = vpop.xlane.xlu0 %324 }
 0x19a   :  { %vm352_vm0 = vcmp.le.f32.partialorder %v1408_v5, %v297_v57  ;;  %732 = vmin.xlane.f32.xlu2 %v1582_v53  ;;  %vm366_vm1 = vcmp.le.f32.partialorder %v1411_v8, %v325_v62 }
 0x19b   :  { %v1587_v20 = vsel %vm352_vm0, %v1439_v39, 128  ;;  %v1594_v4 = vsel %vm366_vm1, %v1439_v39, 128 }
 0x19c   :  { %v547_v1 = vshra.s32 %v1587_v20, 16  ;;  %v743_v16 = vshra.s32 %v1594_v4, 16 }
 0x19e   :  { %v1591_v3 = vcvt.s32.f32 %v547_v1  ;;  %v1598_v5 = vcvt.s32.f32 %v743_v16 }
 0x1a1   :  { %v299_v27 = vpop.xlane.xlu0 %298 }
 0x1a2   :  { %550 = vmin.xlane.f32.xlu2 %v1591_v3  ;;  %vm353_vm7 = vcmp.le.f32.partialorder %v1416_v13, %v299_v27 }
 0x1a3   :  { %v301_v38 = vpop.xlane.xlu2 %300 }
 0x1a4   :  { %vm354_vm2 = vcmp.le.f32.partialorder %v1424_v18, %v301_v38  ;;  %v420_v18 = vand.u32 65535, %v1461_v56  ;;  %v225_v38 = vmul.f32 2.0, %v1347_v22  ;;  %v434_v56 = vand.u32 65535, %v1472_v2 }
 0x1a5   :  { %v1610_v52 = vsel %vm354_vm2, %v1439_v39, 128  ;;  %v448_v2 = vand.u32 65535, %v1489_v14 }
 0x1a6   :  { %2014 = vst [vmem:[#allocation11_spill] sm:$0xff] %v1610_v52  ;;  %v575_v62 = vshra.s32 %v1610_v52, 16  ;;  %v422_v33 = vcvt.s32.f32 %v420_v18  ;;  %v205_v52 = vpop.f32.mrf.mxu2 }
 0x1a8   :  { %v1615_v16 = vcvt.s32.f32 %v575_v62  ;;  %v1627_v62 = vsub.f32 %v1329_v7, %v225_v38 }
 0x1a9   :  { %v1601_v23 = vpop.xlane.xlu0 %328 }
 0x1aa   :  { %746 = vmin.xlane.f32.xlu2 %v1598_v5  ;;  %2015 = vst [vmem:[#allocation12_spill] sm:$0xff] %v1615_v16  ;;  %vm368_vm10 = vcmp.le.f32.partialorder %v1428_v29, %v1601_v23  ;;  %v658_v29 = vand.u32 65535, %v1496_v19 }
 0x1ab   :  { %2016 = vst [vmem:[#allocation13_spill] sm:$0xff] %v1627_v62 }
 0x1bd   :  { %v1605_v8 = vpop.xlane.xlu0 %410 }
 0x1be   :  { %vm412_vm3 = vcmp.eq.f32.partialorder %v1450_v47, %v1605_v8 }
 0x1bf   :  { %v413_v57 = vsel %vm412_vm3, %v408_v41, inf  ;;  %v327_v41 = vpop.xlane.xlu1 %326 }
 0x1c0   :  { %414 = vmin.xlane.f32.xlu1 %v413_v57  ;;  %vm367_vm5 = vcmp.le.f32.partialorder %v1419_v17, %v327_v41  ;;  %v226_v17 = vmul.f32 2.0, %v1357_v28  ;;  %v1662_v28 = vsel %vm353_vm7, %v1439_v39, 128 }
 0x1c1   :  { %v1640_v38 = vsel %vm367_vm5, %v1439_v39, 128  ;;  %v561_v27 = vshra.s32 %v1662_v28, 16 }
 0x1c2   :  { %v757_v41 = vshra.s32 %v1640_v38, 16 }
 0x1c5   :  { %v1613_v1 = vpop.xlane.xlu0 %334 }
 0x1c6   :  { %vm371_vm1 = vcmp.le.f32.partialorder %v1456_v11, %v1613_v1 }
 0x1c7   :  { %v303_v18 = vpop.xlane.xlu1 %302 }
 0x1c8   :  { %578 = vmin.xlane.f32.xlu1 %v1615_v16  ;;  %v240_v16 = vmul.f32 2.0, %v205_v52  ;;  %vm355_vm12 = vcmp.le.f32.partialorder %v1432_v30, %v303_v18  ;;  %v476_v30 = vand.u32 65535, %v1505_v32 }
 0x1ca   :  { %v1635_v22 = vsub.f32 %v1329_v7, %v240_v16  ;;  %v478_v51 = vcvt.s32.f32 %v476_v30 }
 0x1cd   :  { %v1619_v45 = vpop.xlane.xlu0 %424 }
 0x1ce   :  { %vm426_vm4 = vcmp.eq.f32.partialorder %v1464_v58, %v1619_v45  ;;  %v331_v58 = vpop.xlane.xlu2 %330 }
 0x1cf   :  { %v427_v47 = vsel %vm426_vm4, %v422_v33, inf  ;;  %v1645_v52 = vpop.xlane.xlu1 %332  ;;  %vm369_vm8 = vcmp.le.f32.partialorder %v1436_v34, %v331_v58 }
 0x1d0   :  { %428 = vmin.xlane.f32.xlu0 %v427_v47  ;;  %v436_v47 = vcvt.s32.f32 %v434_v56  ;;  %v450_v56 = vcvt.s32.f32 %v448_v2  ;;  %v1665_v13 = vsel %vm369_vm8, %v1439_v39, 128  ;;  %v1680_v2 = vcvt.s32.f32 %v561_v27 }
 0x1d1   :  { %v660_v27 = vcvt.s32.f32 %v658_v29  ;;  %vm370_vm7 = vcmp.le.f32.partialorder %v1443_v44, %v1645_v52 }
 0x1d5   :  { %v1624_v57 = vpop.xlane.xlu0 %336 }
 0x1d8   :  { %308 = vmin.xlane.f32.xlu0 %v1627_v62 }
 0x1dd   :  { %v1632_v33 = vpop.xlane.xlu0 %438  ;;  %v1670_v14 = vpop.xlane.xlu1 %466 }
 0x1de   :  { %vm440_vm6 = vcmp.eq.f32.partialorder %v1482_v9, %v1632_v33  ;;  %vm468_vm11 = vcmp.eq.f32.partialorder %v1484_v10, %v1670_v14 }
 0x1df   :  { %v441_v62 = vsel %vm440_vm6, %v436_v47, inf  ;;  %v1655_v47 = vsub.f32 %v1329_v7, %v226_v17  ;;  %v462_v7 = vand.u32 65535, %v1478_v6  ;;  %v1685_v6 = vsel %vm368_vm10, %v1439_v39, 128 }
 0x1e0   :  { %338 = vmin.xlane.f32.xlu0 %v1635_v22  ;;  %442 = vmin.xlane.f32.xlu2 %v441_v62  ;;  %v1657_v62 = vcvt.s32.f32 %v757_v41  ;;  %v771_v23 = vshra.s32 %v1685_v6, 16 }
 0x1e1   :  { %v464_v41 = vcvt.s32.f32 %v462_v7 }
 0x1e2   :  { %v1698_v7 = vcvt.s32.f32 %v771_v23 }
 0x1e5   :  { %v1650_v9 = vpop.xlane.xlu0 %452  ;;  %v1652_v16 = vpop.xlane.xlu2 %662 }
 0x1e6   :  { %vm454_vm9 = vcmp.eq.f32.partialorder %v1500_v24, %v1650_v9  ;;  %v785_v24 = vshra.s32 %v1665_v13, 16  ;;  %vm664_vm13 = vcmp.eq.f32.partialorder %v1502_v25, %v1652_v16 }
 0x1e7   :  { %v455_v34 = vsel %vm454_vm9, %v450_v56, inf  ;;  %v469_v56 = vsel %vm468_vm11, %v464_v41, inf  ;;  %v1702_v41 = vsel %vm355_vm12, %v1439_v39, 128  ;;  %vm372_vm9 = vcmp.le.f32.partialorder %v1469_v0, %v1624_v57 }
 0x1e8   :  { %310 = vmin.xlane.f32.xlu0 %v1655_v47  ;;  %760 = vmin.xlane.f32.xlu2 %v1657_v62  ;;  %v1682_v17 = vcvt.s32.f32 %v785_v24  ;;  %v700_v24 = vand.u32 65535, %v1547_v49  ;;  %v589_v25 = vshra.s32 %v1702_v41, 16  ;;  %v1716_v49 = vsel %vm356_vm14, %v1439_v39, 128 }
 0x1e9   :  { %456 = vmin.xlane.f32.xlu1 %v455_v34  ;;  %v714_v0 = vand.u32 65535, %v1563_v55  ;;  %vm357_vm12 = vcmp.le.f32.partialorder %v1350_v26, %v1486_v12  ;;  %v532_v26 = vand.u32 65535, %v1568_v37 }
 0x1ea   :  { %v702_v29 = vcvt.s32.f32 %v700_v24  ;;  %v1722_v15 = vcvt.s32.f32 %v589_v25  ;;  %v603_v24 = vshra.s32 %v1716_v49, 16 }
 0x1ed   :  { %v1676_v58 = vpop.xlane.xlu2 %480  ;;  %v1704_v19 = vpop.xlane.xlu0 %676 }
 0x1ee   :  { %v1691_v34 = vpop.xlane.xlu1 %494  ;;  %vm482_vm0 = vcmp.eq.f32.partialorder %v1522_v46, %v1676_v58  ;;  %v1732_v46 = vcvt.s32.f32 %v603_v24  ;;  %vm678_vm3 = vcmp.eq.f32.partialorder %v1520_v42, %v1704_v19 }
 0x1ef   :  { %v483_v32 = vsel %vm482_vm0, %v478_v51, inf  ;;  %vm496_vm5 = vcmp.eq.f32.partialorder %v1524_v50, %v1691_v34 }
 0x1f0   :  { %564 = vmin.xlane.f32.xlu2 %v1680_v2  ;;  %788 = vmin.xlane.f32.xlu0 %v1682_v17 }
 0x1f1   :  { %470 = vmin.xlane.f32.xlu1 %v469_v56  ;;  %v665_v56 = vsel %vm664_vm13, %v660_v27, inf }
 0x1f5   :  { %v1694_v10 = vpop.xlane.xlu2 %690 }
 0x1f6   :  { %vm692_vm8 = vcmp.eq.f32.partialorder %v1541_v63, %v1694_v10 }
 0x1f8   :  { %774 = vmin.xlane.f32.xlu2 %v1698_v7 }
 0x1f9   :  { %666 = vmin.xlane.f32.xlu1 %v665_v56  ;;  %v1727_v56 = vpop.xlane.xlu0 %508 }
 0x1fa   :  { %vm510_vm2 = vcmp.eq.f32.partialorder %v1539_v48, %v1727_v56  ;;  %v490_v48 = vand.u32 65535, %v1517_v40  ;;  %v728_v40 = vand.u32 65535, %v1579_v61 }
 0x1fb   :  { %v1711_v18 = vpop.xlane.xlu1 %704 }
 0x1fc   :  { %2017 = vst [vmem:[#allocation14_spill] sm:$0xff] %v1711_v18  ;;  %vm706_vm15 = vcmp.eq.f32.partialorder %v1554_v31, %v1711_v18  ;;  %v504_v31 = vand.u32 65535, %v1536_v59  ;;  %v672_v18 = vand.u32 65535, %v1511_v36  ;;  %v1743_v36 = vsel %vm371_vm1, %v1439_v39, 128 }
 0x1fd   :  { %v1718_v23 = vpop.xlane.xlu2 %522  ;;  %v707_v27 = vsel %vm706_vm15, %v702_v29, inf  ;;  %v518_v29 = vand.u32 65535, %v1552_v21  ;;  %v730_v50 = vcvt.s32.f32 %v728_v40 }
 0x1fe   :  { %708 = vmin.xlane.f32.xlu0 %v707_v27  ;;  %v506_v25 = vcvt.s32.f32 %v504_v31  ;;  %v674_v59 = vcvt.s32.f32 %v672_v18  ;;  %vm524_vm4 = vcmp.eq.f32.partialorder %v1558_v54, %v1718_v23  ;;  %v813_v27 = vshra.s32 %v1743_v36, 16 }
 0x1ff   :  { %v520_v42 = vcvt.s32.f32 %v518_v29  ;;  %v686_v54 = vand.u32 65535, %v1530_v43  ;;  %v1767_v29 = vsel %vm370_vm7, %v1439_v39, 128  ;;  %v742_v43 = vand.u32 65535, %v1594_v4 }
 0x200   :  { %592 = vmin.xlane.f32.xlu2 %v1722_v15  ;;  %v511_v11 = vsel %vm510_vm2, %v506_v25, inf  ;;  %v679_v1 = vsel %vm678_vm3, %v674_v59, inf  ;;  %v1753_v21 = vcvt.s32.f32 %v813_v27  ;;  %v799_v44 = vshra.s32 %v1767_v29, 16 }
 0x201   :  { %484 = vmin.xlane.f32.xlu1 %v483_v32  ;;  %v525_v18 = vsel %vm524_vm4, %v520_v42, inf  ;;  %v492_v32 = vcvt.s32.f32 %v490_v48  ;;  %v688_v25 = vcvt.s32.f32 %v686_v54  ;;  %v1781_v4 = vsel %vm372_vm9, %v1439_v39, 128 }
 0x202   :  { %v827_v57 = vshra.s32 %v1781_v4, 16  ;;  %v1797_v42 = vsel %vm357_vm12, %v1439_v39, 128 }
 0x203   :  { %v497_v24 = vsel %vm496_vm5, %v492_v32, inf  ;;  %v693_v61 = vsel %vm692_vm8, %v688_v25, inf  ;;  %v617_v55 = vshra.s32 %v1797_v42, 16 }
 0x204   :  { %v1794_v27 = vcvt.s32.f32 %v827_v57 }
 0x205   :  { %v1736_v30 = vpop.xlane.xlu2 %536  ;;  %v1801_v32 = vcvt.s32.f32 %v617_v55 }
 0x206   :  { %606 = vmin.xlane.f32.xlu0 %v1732_v46  ;;  %vm538_vm14 = vcmp.eq.f32.partialorder %v1574_v60, %v1736_v30 }
 0x208   :  { %512 = vmin.xlane.f32.xlu2 %v511_v11  ;;  %v744_v11 = vcvt.s32.f32 %v742_v43 }
 0x209   :  { %680 = vmin.xlane.f32.xlu1 %v679_v1  ;;  %v1783_v1 = vcvt.s32.f32 %v799_v44  ;;  %v2018_v44 = vld [vmem:[#allocation13_spill] sm:$0xff] }
 0x20d   :  { %v1749_v51 = vpop.xlane.xlu2 %732 }
 0x20e   :  { %526 = vmin.xlane.f32.xlu0 %v525_v18  ;;  %vm734_vm6 = vcmp.eq.f32.partialorder %v1582_v53, %v1749_v51  ;;  %v546_v53 = vand.u32 65535, %v1587_v20 }
 0x20f   :  { %v735_v59 = vsel %vm734_vm6, %v730_v50, inf  ;;  %v534_v50 = vcvt.s32.f32 %v532_v26  ;;  %v459_v26 = vcvt.f32.s32 %v1650_v9  ;;  %v560_v9 = vand.u32 65535, %v1662_v28 }
 0x210   :  { %816 = vmin.xlane.f32.xlu2 %v1753_v21  ;;  %v548_v52 = vcvt.s32.f32 %v546_v53 }
 0x211   :  { %498 = vmin.xlane.f32.xlu1 %v497_v24  ;;  %v417_v24 = vcvt.f32.s32 %v1605_v8  ;;  %v539_v25 = vsel %vm538_vm14, %v534_v50, inf  ;;  %v431_v8 = vcvt.f32.s32 %v1619_v45 }
 0x213   :  { %v432_v43 = vshll.u32 %v431_v8, 16 }
 0x215   :  { %v1762_v31 = vpop.xlane.xlu2 %550 }
 0x216   :  { %vm552_vm10 = vcmp.eq.f32.partialorder %v1591_v3, %v1762_v31  ;;  %v1787_v3 = vpop.xlane.xlu0 %718 }
 0x217   :  { %v553_v20 = vsel %vm552_vm10, %v548_v52, inf  ;;  %vm720_vm13 = vcmp.eq.f32.partialorder %v1570_v35, %v1787_v3  ;;  %v418_v35 = vshll.u32 %v417_v24, 16  ;;  %v756_v24 = vand.u32 65535, %v1640_v38 }
 0x218   :  { %736 = vmin.xlane.f32.xlu2 %v735_v59  ;;  %v1292_v59 = vmov 1.0  }
 0x219   :  { %694 = vmin.xlane.f32.xlu1 %v693_v61 }
 0x21d   :  { %v1776_v63 = vpop.xlane.xlu2 %746 }
 0x21e   :  { %vm748_vm11 = vcmp.eq.f32.partialorder %v1598_v5, %v1776_v63  ;;  %v716_v5 = vcvt.s32.f32 %v714_v0 }
 0x21f   :  { %v749_v48 = vsel %vm748_vm11, %v744_v11, inf }
 0x220   :  { %554 = vmin.xlane.f32.xlu2 %v553_v20  ;;  %750 = vmin.xlane.f32.xlu0 %v749_v48  ;;  %v721_v18 = vsel %vm720_vm13, %v716_v5, inf  ;;  %v445_v20 = vcvt.f32.s32 %v1632_v33 }
 0x221   :  { %802 = vmin.xlane.f32.xlu1 %v1783_v1 }
 0x222   :  { %v446_v0 = vshll.u32 %v445_v20, 16  ;;  %v2019_v20 = vld [vmem:[#allocation11_spill] sm:$0xff] }
 0x228   :  { %830 = vmin.xlane.f32.xlu0 %v1794_v27 }
 0x229   :  { %722 = vmin.xlane.f32.xlu1 %v721_v18 }
 0x231   :  { %620 = vmin.xlane.f32.xlu1 %v1801_v32 }
 0x233   :  { %v415_v12 = vpop.xlane.xlu1 %414 }
 0x234   :  { %v416_v40 = vcvt.f32.s32 %v415_v12  ;;  %v758_v12 = vcvt.s32.f32 %v756_v24  ;;  %v2020_v24 = vld [vmem:[#allocation12_spill] sm:$0xff] }
 0x236   :  { %v419_v54 = vadd.s32 %v418_v35, %v416_v40  ;;  %v460_v40 = vshll.u32 %v459_v26, 16 }
 0x238   :  { %vm854_vm15 = vcmp.eq.s32.totalorder %v1439_v39, %v419_v54 }
 0x239   :  { %540 = vmin.xlane.f32.xlu1 %v539_v25  ;;  %1147 = vmatmul.msk.f32.vlgmr.msra.gmra.mxu1 %vm854_vm15, %v1292_v59 }
 0x23b   :  { %v1822_v57 = vpop.xlane.xlu1 %578 }
 0x23c   :  { %vm580_vm9 = vcmp.eq.f32.partialorder %v2020_v24, %v1822_v57 }
 0x243   :  { %v429_v61 = vpop.xlane.xlu0 %428 }
 0x244   :  { %v430_v37 = vcvt.f32.s32 %v429_v61  ;;  %v473_v61 = vcvt.f32.s32 %v1670_v14 }
 0x246   :  { %v433_v53 = vadd.s32 %v432_v43, %v430_v37  ;;  %v562_v43 = vcvt.s32.f32 %v560_v9  ;;  %v474_v28 = vshll.u32 %v473_v61, 16  ;;  %v784_v9 = vand.u32 65535, %v1665_v13 }
 0x248   :  { %vm855_vm0 = vcmp.eq.s32.totalorder %v1439_v39, %v433_v53  ;;  %v786_v61 = vcvt.s32.f32 %v784_v9 }
 0x249   :  { %1148 = vmatmul.msk.f32.gmra.mxu1 %vm855_vm0, %v1292_v59 }
 0x24b   :  { %v309_v60 = vpop.xlane.xlu0 %308 }
 0x24c   :  { %vm358_vm1 = vcmp.le.f32.partialorder %v2018_v44, %v309_v60 }
 0x24d   :  { %v1815_v52 = vsel %vm358_vm1, %v1439_v39, 128 }
 0x24e   :  { %v631_v11 = vshra.s32 %v1815_v52, 16 }
 0x250   :  { %v1819_v48 = vcvt.s32.f32 %v631_v11 }
 0x252   :  { %634 = vmin.xlane.f32.xlu2 %v1819_v48 }
 0x253   :  { %v443_v45 = vpop.xlane.xlu2 %442  ;;  %v339_v18 = vpop.xlane.xlu0 %338 }
 0x254   :  { %v444_v5 = vcvt.f32.s32 %v443_v45  ;;  %vm373_vm3 = vcmp.le.f32.partialorder %v1635_v22, %v339_v18  ;;  %v574_v45 = vand.u32 65535, %v2019_v20 }
 0x255   :  { %v1834_v54 = vsel %vm373_vm3, %v1439_v39, 128 }
 0x256   :  { %v447_v55 = vadd.s32 %v446_v0, %v444_v5  ;;  %v841_v22 = vshra.s32 %v1834_v54, 16  ;;  %v669_v5 = vcvt.f32.s32 %v1652_v16 }
 0x258   :  { %vm856_vm2 = vcmp.eq.s32.totalorder %v1439_v39, %v447_v55  ;;  %v1844_v53 = vcvt.s32.f32 %v841_v22  ;;  %v670_v16 = vshll.u32 %v669_v5, 16 }
 0x259   :  { %1149 = vmatmul.msk.f32.gmra.mxu1 %vm856_vm2, %v1292_v59 }
 0x25b   :  { %v1829_v33 = vpop.xlane.xlu2 %760  ;;  %v311_v25 = vpop.xlane.xlu0 %310 }
 0x25c   :  { %v457_v35 = vpop.xlane.xlu1 %456  ;;  %vm762_vm4 = vcmp.eq.f32.partialorder %v1657_v62, %v1829_v33  ;;  %vm359_vm6 = vcmp.le.f32.partialorder %v1655_v47, %v311_v25  ;;  %v770_v47 = vand.u32 65535, %v1685_v6 }
 0x25d   :  { %v458_v38 = vcvt.f32.s32 %v457_v35  ;;  %v763_v50 = vsel %vm762_vm4, %v758_v12, inf  ;;  %v1849_v60 = vsel %vm359_vm6, %v1439_v39, 128  ;;  %v576_v12 = vcvt.s32.f32 %v574_v45 }
 0x25e   :  { %764 = vmin.xlane.f32.xlu1 %v763_v50  ;;  %v645_v0 = vshra.s32 %v1849_v60, 16  ;;  %v772_v55 = vcvt.s32.f32 %v770_v47  ;;  %v588_v50 = vand.u32 65535, %v1702_v41  ;;  %v683_v47 = vcvt.f32.s32 %v1704_v19 }
 0x25f   :  { %v461_v8 = vadd.s32 %v460_v40, %v458_v38  ;;  %v581_v38 = vsel %vm580_vm9, %v576_v12, inf  ;;  %v501_v19 = vcvt.f32.s32 %v1691_v34  ;;  %v697_v34 = vcvt.f32.s32 %v1694_v10 }
 0x260   :  { %v1866_v26 = vcvt.s32.f32 %v645_v0  ;;  %v684_v45 = vshll.u32 %v683_v47, 16 }
 0x261   :  { %vm857_vm5 = vcmp.eq.s32.totalorder %v1439_v39, %v461_v8  ;;  %v487_v8 = vcvt.f32.s32 %v1676_v58  ;;  %v502_v12 = vshll.u32 %v501_v19, 16 }
 0x262   :  { %1150 = vmatmul.msk.f32.gmra.mxu1 %vm857_vm5, %v1292_v59 }
 0x263   :  { %v1842_v62 = vpop.xlane.xlu2 %564  ;;  %v1856_v18 = vpop.xlane.xlu0 %788  ;;  %v488_v13 = vshll.u32 %v487_v8, 16  ;;  %v698_v8 = vshll.u32 %v697_v34, 16 }
 0x264   :  { %v471_v37 = vpop.xlane.xlu1 %470  ;;  %vm566_vm7 = vcmp.eq.f32.partialorder %v1680_v2, %v1842_v62  ;;  %vm790_vm12 = vcmp.eq.f32.partialorder %v1682_v17, %v1856_v18 }
 0x265   :  { %v472_v14 = vcvt.f32.s32 %v471_v37  ;;  %v567_v44 = vsel %vm566_vm7, %v562_v43, inf  ;;  %v590_v43 = vcvt.s32.f32 %v588_v50  ;;  %v791_v58 = vsel %vm790_vm12, %v786_v61, inf }
 0x266   :  { %844 = vmin.xlane.f32.xlu1 %v1844_v53  ;;  %568 = vmin.xlane.f32.xlu0 %v567_v44 }
 0x267   :  { %v475_v11 = vadd.s32 %v474_v28, %v472_v14  ;;  %v602_v14 = vand.u32 65535, %v1716_v49  ;;  %v812_v49 = vand.u32 65535, %v1743_v36  ;;  %v515_v36 = vcvt.f32.s32 %v1727_v56 }
 0x268   :  { %v798_v56 = vand.u32 65535, %v1767_v29 }
 0x269   :  { %vm858_vm8 = vcmp.eq.s32.totalorder %v1439_v39, %v475_v11  ;;  %v604_v11 = vcvt.s32.f32 %v602_v14  ;;  %v516_v50 = vshll.u32 %v515_v36, 16 }
 0x26a   :  { %1151 = vmatmul.msk.f32.gmra.mxu1 %vm858_vm8, %v1292_v59 }
 0x26b   :  { %v1860_v2 = vpop.xlane.xlu2 %774 }
 0x26c   :  { %v667_v6 = vpop.xlane.xlu1 %666  ;;  %vm776_vm10 = vcmp.eq.f32.partialorder %v1698_v7, %v1860_v2 }
 0x26d   :  { %v668_v35 = vcvt.f32.s32 %v667_v6  ;;  %v777_v40 = vsel %vm776_vm10, %v772_v55, inf  ;;  %v814_v6 = vcvt.s32.f32 %v812_v49 }
 0x26e   :  { %778 = vmin.xlane.f32.xlu2 %v777_v40  ;;  %648 = vmin.xlane.f32.xlu0 %v1866_v26 }
 0x26f   :  { %v671_v25 = vadd.s32 %v670_v16, %v668_v35  ;;  %582 = vmin.xlane.f32.xlu1 %v581_v38 }
 0x271   :  { %v1872_v22 = vpop.xlane.xlu0 %708  ;;  %vm872_vm11 = vcmp.eq.s32.totalorder %v1439_v39, %v671_v25 }
 0x272   :  { %1165 = vmatmul.msk.f32.vlgmr.msra.gmra.mxu3 %vm872_vm11, %v1292_v59  ;;  %v710_v10 = vcvt.f32.s32 %v1872_v22  ;;  %v826_v22 = vand.u32 65535, %v1781_v4 }
 0x273   :  { %v1878_v7 = vpop.xlane.xlu2 %592 }
 0x274   :  { %v485_v41 = vpop.xlane.xlu1 %484  ;;  %vm594_vm13 = vcmp.eq.f32.partialorder %v1722_v15, %v1878_v7 }
 0x275   :  { %v486_v37 = vcvt.f32.s32 %v485_v41  ;;  %v595_v28 = vsel %vm594_vm13, %v590_v43, inf  ;;  %v2021_v43 = vld [vmem:[#allocation14_spill] sm:$0xff] }
 0x276   :  { %792 = vmin.xlane.f32.xlu2 %v791_v58  ;;  %596 = vmin.xlane.f32.xlu0 %v595_v28  ;;  %v711_v41 = vcvt.f32.s32 %v2021_v43 }
 0x277   :  { %v489_v44 = vadd.s32 %v488_v13, %v486_v37  ;;  %v529_v13 = vcvt.f32.s32 %v1718_v23  ;;  %v800_v23 = vcvt.s32.f32 %v798_v56 }
 0x278   :  { %v712_v28 = vshll.u32 %v711_v41, 16 }
 0x279   :  { %v1884_v17 = vpop.xlane.xlu0 %606  ;;  %vm859_vm14 = vcmp.eq.s32.totalorder %v1439_v39, %v489_v44  ;;  %v530_v14 = vshll.u32 %v529_v13, 16 }
 0x27a   :  { %1152 = vmatmul.msk.f32.gmra.mxu1 %vm859_vm14, %v1292_v59  ;;  %vm608_vm15 = vcmp.eq.f32.partialorder %v1732_v46, %v1884_v17 }
 0x27b   :  { %v513_v15 = vpop.xlane.xlu2 %512  ;;  %v609_v5 = vsel %vm608_vm15, %v604_v11, inf }
 0x27c   :  { %v681_v20 = vpop.xlane.xlu1 %680  ;;  %v514_v38 = vcvt.f32.s32 %v513_v15  ;;  %v713_v15 = vadd.s32 %v712_v28, %v710_v10  ;;  %v767_v10 = vcvt.f32.s32 %v1829_v33 }
 0x27d   :  { %v682_v0 = vcvt.f32.s32 %v681_v20  ;;  %v725_v20 = vcvt.f32.s32 %v1787_v3  ;;  %v739_v3 = vcvt.f32.s32 %v1749_v51  ;;  %v543_v51 = vcvt.f32.s32 %v1736_v30 }
 0x27e   :  { %610 = vmin.xlane.f32.xlu2 %v609_v5  ;;  %v517_v61 = vadd.s32 %v516_v50, %v514_v38  ;;  %vm875_vm7 = vcmp.eq.s32.totalorder %v1439_v39, %v713_v15  ;;  %v768_v28 = vshll.u32 %v767_v10, 16 }
 0x27f   :  { %v685_v55 = vadd.s32 %v684_v45, %v682_v0  ;;  %v828_v0 = vcvt.s32.f32 %v826_v22  ;;  %v544_v50 = vshll.u32 %v543_v51, 16 }
 0x280   :  { %vm861_vm3 = vcmp.eq.s32.totalorder %v1439_v39, %v517_v61  ;;  %v557_v61 = vcvt.f32.s32 %v1762_v31  ;;  %v630_v31 = vand.u32 65535, %v1815_v52  ;;  %v571_v52 = vcvt.f32.s32 %v1842_v62 }
 0x281   :  { %vm873_vm0 = vcmp.eq.s32.totalorder %v1439_v39, %v685_v55  ;;  %v527_v9 = vpop.xlane.xlu0 %526  ;;  %v781_v62 = vcvt.f32.s32 %v1860_v2 }
 0x282   :  { %1166 = vmatmul.msk.f32.gmra.mxu3 %vm873_vm0, %v1292_v59  ;;  %v528_v58 = vcvt.f32.s32 %v527_v9  ;;  %v558_v30 = vshll.u32 %v557_v61, 16  ;;  %v632_v13 = vcvt.s32.f32 %v630_v31  ;;  %v572_v22 = vshll.u32 %v571_v52, 16 }
 0x283   :  { %v1894_v24 = vpop.xlane.xlu2 %816 }
 0x284   :  { %v499_v46 = vpop.xlane.xlu1 %498  ;;  %vm818_vm1 = vcmp.eq.f32.partialorder %v1753_v21, %v1894_v24  ;;  %v531_v11 = vadd.s32 %v530_v14, %v528_v58 }
 0x285   :  { %v500_v16 = vcvt.f32.s32 %v499_v46  ;;  %v819_v35 = vsel %vm818_vm1, %v814_v6, inf  ;;  %v616_v6 = vand.u32 65535, %v1797_v42 }
 0x286   :  { %820 = vmin.xlane.f32.xlu0 %v819_v35  ;;  %vm862_vm6 = vcmp.eq.s32.totalorder %v1439_v39, %v531_v11 }
 0x287   :  { %v503_v40 = vadd.s32 %v502_v12, %v500_v16  ;;  %v740_v12 = vshll.u32 %v739_v3, 16  ;;  %v618_v35 = vcvt.s32.f32 %v616_v6 }
 0x289   :  { %vm860_vm2 = vcmp.eq.s32.totalorder %v1439_v39, %v503_v40  ;;  %v753_v40 = vcvt.f32.s32 %v1776_v63 }
 0x28a   :  { %1153 = vmatmul.msk.f32.gmra.mxu1 %vm860_vm2, %v1292_v59 }
 0x28b   :  { %v737_v55 = vpop.xlane.xlu2 %736  ;;  %v754_v34 = vshll.u32 %v753_v40, 16 }
 0x28c   :  { %v695_v25 = vpop.xlane.xlu1 %694  ;;  %v738_v46 = vcvt.f32.s32 %v737_v55 }
 0x28d   :  { %v696_v21 = vcvt.f32.s32 %v695_v25 }
 0x28f   :  { %v699_v37 = vadd.s32 %v698_v8, %v696_v21 }
 0x291   :  { %vm874_vm4 = vcmp.eq.s32.totalorder %v1439_v39, %v699_v37 }
 0x292   :  { %1154 = vmatmul.msk.f32.gmra.mxu1 %vm861_vm3, %v1292_v59  ;;  %1167 = vmatmul.msk.f32.gmra.mxu3 %vm874_vm4, %v1292_v59 }
 0x293   :  { %v751_v44 = vpop.xlane.xlu0 %750  ;;  %v555_v8 = vpop.xlane.xlu2 %554 }
 0x294   :  { %v1910_v47 = vpop.xlane.xlu1 %802  ;;  %v752_v42 = vcvt.f32.s32 %v751_v44  ;;  %v556_v21 = vcvt.f32.s32 %v555_v8 }
 0x295   :  { %vm804_vm5 = vcmp.eq.f32.partialorder %v1783_v1, %v1910_v47  ;;  %v726_v1 = vshll.u32 %v725_v20, 16 }
 0x296   :  { %v805_v29 = vsel %vm804_vm5, %v800_v23, inf  ;;  %v755_v9 = vadd.s32 %v754_v34, %v752_v42  ;;  %v559_v63 = vadd.s32 %v558_v30, %v556_v21  ;;  %v840_v23 = vand.u32 65535, %v1834_v54 }
 0x297   :  { %806 = vmin.xlane.f32.xlu1 %v805_v29  ;;  %v644_v54 = vand.u32 65535, %v1849_v60  ;;  %v809_v21 = vcvt.f32.s32 %v1910_v47 }
 0x298   :  { %vm878_vm13 = vcmp.eq.s32.totalorder %v1439_v39, %v755_v9  ;;  %vm864_vm14 = vcmp.eq.s32.totalorder %v1439_v39, %v559_v63  ;;  %v842_v29 = vcvt.s32.f32 %v840_v23 }
 0x299   :  { %v646_v55 = vcvt.s32.f32 %v644_v54 }
 0x29a   :  { %1155 = vmatmul.msk.f32.gmra.mxu1 %vm862_vm6, %v1292_v59  ;;  %1168 = vmatmul.msk.f32.gmra.mxu3 %vm875_vm7, %v1292_v59 }
 0x29b   :  { %v1920_v45 = vpop.xlane.xlu0 %830 }
 0x29c   :  { %v723_v5 = vpop.xlane.xlu1 %722  ;;  %vm832_vm8 = vcmp.eq.f32.partialorder %v1794_v27, %v1920_v45  ;;  %v741_v27 = vadd.s32 %v740_v12, %v738_v46  ;;  %v795_v12 = vcvt.f32.s32 %v1856_v18  ;;  %v837_v47 = vcvt.f32.s32 %v1920_v45 }
 0x29d   :  { %v724_v4 = vcvt.f32.s32 %v723_v5  ;;  %v833_v49 = vsel %vm832_vm8, %v828_v0, inf  ;;  %v585_v5 = vcvt.f32.s32 %v1822_v57 }
 0x29e   :  { %834 = vmin.xlane.f32.xlu2 %v833_v49  ;;  %vm877_vm11 = vcmp.eq.s32.totalorder %v1439_v39, %v741_v27  ;;  %v796_v40 = vshll.u32 %v795_v12, 16 }
 0x29f   :  { %v727_v19 = vadd.s32 %v726_v1, %v724_v4  ;;  %v586_v60 = vshll.u32 %v585_v5, 16 }
 0x2a1   :  { %vm876_vm9 = vcmp.eq.s32.totalorder %v1439_v39, %v727_v19 }
 0x2a2   :  { %1169 = vmatmul.msk.f32.gmra.mxu3 %vm876_vm9, %v1292_v59 }
 0x2a4   :  { %v1928_v16 = vpop.xlane.xlu1 %620 }
 0x2a5   :  { %vm622_vm10 = vcmp.eq.f32.partialorder %v1801_v32, %v1928_v16  ;;  %v627_v52 = vcvt.f32.s32 %v1928_v16 }
 0x2a6   :  { %v623_v36 = vsel %vm622_vm10, %v618_v35, inf  ;;  %v599_v35 = vcvt.f32.s32 %v1878_v7  ;;  %v613_v7 = vcvt.f32.s32 %v1884_v17 }
 0x2a7   :  { %624 = vmin.xlane.f32.xlu1 %v623_v36 }
 0x2a8   :  { %v600_v51 = vshll.u32 %v599_v35, 16  ;;  %v614_v9 = vshll.u32 %v613_v7, 16 }
 0x2aa   :  { %1170 = vmatmul.msk.f32.gmra.mxu3 %vm877_vm11, %v1292_v59 }
 0x2ac   :  { %v541_v38 = vpop.xlane.xlu1 %540 }
 0x2ad   :  { %v542_v25 = vcvt.f32.s32 %v541_v38 }
 0x2af   :  { %v545_v32 = vadd.s32 %v544_v50, %v542_v25 }
 0x2b1   :  { %vm863_vm12 = vcmp.eq.s32.totalorder %v1439_v39, %v545_v32 }
 0x2b2   :  { %1156 = vmatmul.msk.f32.gmra.mxu1 %vm863_vm12, %v1292_v59  ;;  %1171 = vmatmul.msk.f32.gmra.mxu3 %vm878_vm13, %v1292_v59 }
 0x2b6   :  { %v967_v43 = vpop.f32.mrf.mxu1 }
 0x2b7   :  { %1063 = vst [vmem:[#allocation7] sm:$0xff] %v967_v43  ;;  %v810_v43 = vshll.u32 %v809_v21, 16 }
 0x2ba   :  { %1157 = vmatmul.msk.f32.gmra.mxu1 %vm864_vm14, %v1292_v59 }
 0x2c5   :  { %v1944_v41 = vpop.xlane.xlu2 %634 }
 0x2c6   :  { %v970_v37 = vpop.f32.mrf.mxu1  ;;  %vm636_vm15 = vcmp.eq.f32.partialorder %v1819_v48, %v1944_v41 }
 0x2c7   :  { %1064 = vst [vmem:[#allocation7 + $0x8] sm:$0xff] %v970_v37  ;;  %v637_v56 = vsel %vm636_vm15, %v632_v13, inf  ;;  %v823_v37 = vcvt.f32.s32 %v1894_v24  ;;  %v838_v24 = vshll.u32 %v837_v47, 16 }
 0x2c8   :  { %638 = vmin.xlane.f32.xlu0 %v637_v56 }
 0x2d1   :  { %v765_v58 = vpop.xlane.xlu1 %764 }
 0x2d2   :  { %v766_v14 = vcvt.f32.s32 %v765_v58 }
 0x2d4   :  { %v769_v44 = vadd.s32 %v768_v28, %v766_v14  ;;  %v824_v28 = vshll.u32 %v823_v37, 16 }
 0x2d6   :  { %v973_v15 = vpop.f32.mrf.mxu1  ;;  %vm879_vm0 = vcmp.eq.s32.totalorder %v1439_v39, %v769_v44 }
 0x2d7   :  { %1065 = vst [vmem:[#allocation7 + $0x10] sm:$0xff] %v973_v15  ;;  %1172 = vmatmul.msk.f32.gmra.mxu3 %vm879_vm0, %v1292_v59 }
 0x2d9   :  { %v569_v48 = vpop.xlane.xlu0 %568  ;;  %v1953_v11 = vpop.xlane.xlu1 %844 }
 0x2da   :  { %v570_v33 = vcvt.f32.s32 %v569_v48  ;;  %vm846_vm1 = vcmp.eq.f32.partialorder %v1844_v53, %v1953_v11  ;;  %v782_v53 = vshll.u32 %v781_v62, 16 }
 0x2db   :  { %v847_v20 = vsel %vm846_vm1, %v842_v29, inf }
 0x2dc   :  { %v573_v0 = vadd.s32 %v572_v22, %v570_v33  ;;  %848 = vmin.xlane.f32.xlu1 %v847_v20  ;;  %v628_v22 = vshll.u32 %v627_v52, 16 }
 0x2de   :  { %vm865_vm2 = vcmp.eq.s32.totalorder %v1439_v39, %v573_v0 }
 0x2df   :  { %v976_v1 = vpop.f32.mrf.mxu1  ;;  %1158 = vmatmul.msk.f32.gmra.mxu1 %vm865_vm2, %v1292_v59 }
 0x2e0   :  { %1066 = vst [vmem:[#allocation7 + $0x18] sm:$0xff] %v976_v1 }
 0x2e1   :  { %v779_v4 = vpop.xlane.xlu2 %778  ;;  %v1962_v49 = vpop.xlane.xlu0 %648 }
 0x2e2   :  { %v780_v3 = vcvt.f32.s32 %v779_v4  ;;  %v583_v19 = vpop.xlane.xlu1 %582  ;;  %vm650_vm3 = vcmp.eq.f32.partialorder %v1866_v26, %v1962_v49  ;;  %v641_v4 = vcvt.f32.s32 %v1944_v41  ;;  %v655_v12 = vcvt.f32.s32 %v1962_v49 }
 0x2e3   :  { %v584_v2 = vcvt.f32.s32 %v583_v19  ;;  %v651_v6 = vsel %vm650_vm3, %v646_v55, inf }
 0x2e4   :  { %v783_v46 = vadd.s32 %v782_v53, %v780_v3  ;;  %652 = vmin.xlane.f32.xlu2 %v651_v6  ;;  %v642_v53 = vshll.u32 %v641_v4, 16  ;;  %v656_v35 = vshll.u32 %v655_v12, 16 }
 0x2e5   :  { %v587_v57 = vadd.s32 %v586_v60, %v584_v2  ;;  %v851_v60 = vcvt.f32.s32 %v1953_v11 }
 0x2e6   :  { %vm880_vm4 = vcmp.eq.s32.totalorder %v1439_v39, %v783_v46 }
 0x2e7   :  { %v979_v27 = vpop.f32.mrf.mxu1  ;;  %vm866_vm5 = vcmp.eq.s32.totalorder %v1439_v39, %v587_v57  ;;  %1173 = vmatmul.msk.f32.gmra.mxu3 %vm880_vm4, %v1292_v59  ;;  %v852_v6 = vshll.u32 %v851_v60, 16 }
 0x2e8   :  { %1067 = vst [vmem:[#allocation7 + $0x20] sm:$0xff] %v979_v27  ;;  %1159 = vmatmul.msk.f32.gmra.mxu1 %vm866_vm5, %v1292_v59 }
 0x2e9   :  { %v793_v26 = vpop.xlane.xlu2 %792  ;;  %v597_v36 = vpop.xlane.xlu0 %596 }
 0x2ea   :  { %v794_v42 = vcvt.f32.s32 %v793_v26  ;;  %v598_v34 = vcvt.f32.s32 %v597_v36 }
 0x2ec   :  { %v797_v38 = vadd.s32 %v796_v40, %v794_v42  ;;  %v601_v18 = vadd.s32 %v600_v51, %v598_v34 }
 0x2ee   :  { %vm867_vm6 = vcmp.eq.s32.totalorder %v1439_v39, %v601_v18  ;;  %vm881_vm7 = vcmp.eq.s32.totalorder %v1439_v39, %v797_v38 }
 0x2ef   :  { %1174 = vmatmul.msk.f32.gmra.mxu3 %vm881_vm7, %v1292_v59 }
 0x2f0   :  { %1160 = vmatmul.msk.f32.gmra.mxu1 %vm867_vm6, %v1292_v59 }
 0x2f1   :  { %v611_v50 = vpop.xlane.xlu2 %610 }
 0x2f2   :  { %v612_v25 = vcvt.f32.s32 %v611_v50 }
 0x2f4   :  { %v615_v8 = vadd.s32 %v614_v9, %v612_v25 }
 0x2f5   :  { %v1021_v61 = vpop.f32.mrf.mxu3 }
 0x2f6   :  { %1081 = vst [vmem:[#allocation7 + $0x90] sm:$0xff] %v1021_v61  ;;  %vm868_vm8 = vcmp.eq.s32.totalorder %v1439_v39, %v615_v8 }
 0x2f7   :  { %v982_v32 = vpop.f32.mrf.mxu1 }
 0x2f8   :  { %1068 = vst [vmem:[#allocation7 + $0x28] sm:$0xff] %v982_v32  ;;  %1161 = vmatmul.msk.f32.gmra.mxu1 %vm868_vm8, %v1292_v59 }
 0x2f9   :  { %v821_v13 = vpop.xlane.xlu0 %820 }
 0x2fa   :  { %v822_v10 = vcvt.f32.s32 %v821_v13 }
 0x2fc   :  { %v825_v14 = vadd.s32 %v824_v28, %v822_v10 }
 0x2fe   :  { %vm883_vm10 = vcmp.eq.s32.totalorder %v1439_v39, %v825_v14 }
 0x305   :  { %v1024_v17 = vpop.f32.mrf.mxu3 }
 0x306   :  { %1082 = vst [vmem:[#allocation7 + $0x98] sm:$0xff] %v1024_v17 }
 0x307   :  { %v985_v30 = vpop.f32.mrf.mxu1 }
 0x308   :  { %1069 = vst [vmem:[#allocation7 + $0x30] sm:$0xff] %v985_v30 }
 0x30a   :  { %v807_v63 = vpop.xlane.xlu1 %806 }
 0x30b   :  { %v808_v31 = vcvt.f32.s32 %v807_v63 }
 0x30d   :  { %v811_v56 = vadd.s32 %v810_v43, %v808_v31 }
 0x30f   :  { %v988_v58 = vpop.f32.mrf.mxu1  ;;  %vm882_vm9 = vcmp.eq.s32.totalorder %v1439_v39, %v811_v56 }
 0x310   :  { %1070 = vst [vmem:[#allocation7 + $0x38] sm:$0xff] %v988_v58  ;;  %1175 = vmatmul.msk.f32.gmra.mxu3 %vm882_vm9, %v1292_v59 }
 0x311   :  { %v835_v44 = vpop.xlane.xlu2 %834 }
 0x312   :  { %v836_v15 = vcvt.f32.s32 %v835_v44 }
 0x314   :  { %v839_v33 = vadd.s32 %v838_v24, %v836_v15 }
 0x315   :  { %v1027_v23 = vpop.f32.mrf.mxu3 }
 0x316   :  { %1083 = vst [vmem:[#allocation7 + $0xa0] sm:$0xff] %v1027_v23  ;;  %vm884_vm12 = vcmp.eq.s32.totalorder %v1439_v39, %v839_v33 }
 0x317   :  { %v991_v48 = vpop.f32.mrf.mxu1 }
 0x318   :  { %1071 = vst [vmem:[#allocation7 + $0x40] sm:$0xff] %v991_v48  ;;  %1176 = vmatmul.msk.f32.gmra.mxu3 %vm883_vm10, %v1292_v59 }
 0x31a   :  { %v625_v29 = vpop.xlane.xlu1 %624 }
 0x31b   :  { %v626_v20 = vcvt.f32.s32 %v625_v29 }
 0x31d   :  { %v629_v0 = vadd.s32 %v628_v22, %v626_v20  ;;  %v1030_v54 = vpop.f32.mrf.mxu3 }
 0x31e   :  { %1084 = vst [vmem:[#allocation7 + $0xa8] sm:$0xff] %v1030_v54 }
 0x31f   :  { %vm869_vm11 = vcmp.eq.s32.totalorder %v1439_v39, %v629_v0 }
 0x320   :  { %1162 = vmatmul.msk.f32.gmra.mxu1 %vm869_vm11, %v1292_v59  ;;  %1177 = vmatmul.msk.f32.gmra.mxu3 %vm884_vm12, %v1292_v59 }
 0x325   :  { %v1033_v45 = vpop.f32.mrf.mxu3 }
 0x326   :  { %1085 = vst [vmem:[#allocation7 + $0xb0] sm:$0xff] %v1033_v45 }
 0x32d   :  { %v1036_v16 = vpop.f32.mrf.mxu3 }
 0x32e   :  { %1086 = vst [vmem:[#allocation7 + $0xb8] sm:$0xff] %v1036_v16 }
 0x32f   :  { %v994_v62 = vpop.f32.mrf.mxu1 }
 0x330   :  { %1072 = vst [vmem:[#allocation7 + $0x48] sm:$0xff] %v994_v62 }
 0x335   :  { %v1039_v5 = vpop.f32.mrf.mxu3 }
 0x336   :  { %1087 = vst [vmem:[#allocation7 + $0xc0] sm:$0xff] %v1039_v5 }
 0x337   :  { %v997_v1 = vpop.f32.mrf.mxu1 }
 0x338   :  { %1073 = vst [vmem:[#allocation7 + $0x50] sm:$0xff] %v997_v1 }
 0x33b   :  { %v639_v55 = vpop.xlane.xlu0 %638 }
 0x33c   :  { %v640_v3 = vcvt.f32.s32 %v639_v55 }
 0x33e   :  { %v643_v19 = vadd.s32 %v642_v53, %v640_v3 }
 0x340   :  { %vm870_vm13 = vcmp.eq.s32.totalorder %v1439_v39, %v643_v19 }
 0x341   :  { %1163 = vmatmul.msk.f32.gmra.mxu1 %vm870_vm13, %v1292_v59 }
 0x34f   :  { %v849_v2 = vpop.xlane.xlu1 %848 }
 0x350   :  { %v850_v46 = vcvt.f32.s32 %v849_v2 }
 0x352   :  { %v853_v57 = vadd.s32 %v852_v6, %v850_v46 }
 0x354   :  { %vm885_vm14 = vcmp.eq.s32.totalorder %v1439_v39, %v853_v57 }
 0x355   :  { %1178 = vmatmul.msk.f32.gmra.mxu3 %vm885_vm14, %v1292_v59 }
 0x357   :  { %v653_v41 = vpop.xlane.xlu2 %652 }
 0x358   :  { %v654_v27 = vcvt.f32.s32 %v653_v41 }
 0x35a   :  { %v657_v26 = vadd.s32 %v656_v35, %v654_v27  ;;  %v1042_v36 = vpop.f32.mrf.mxu3 }
 0x35b   :  { %1088 = vst [vmem:[#allocation7 + $0xc8] sm:$0xff] %v1042_v36 }
 0x35c   :  { %v1000_v40 = vpop.f32.mrf.mxu1  ;;  %vm871_vm15 = vcmp.eq.s32.totalorder %v1439_v39, %v657_v26 }
 0x35d   :  { %1074 = vst [vmem:[#allocation7 + $0x58] sm:$0xff] %v1000_v40  ;;  %1164 = vmatmul.msk.f32.gmra.mxu1 %vm871_vm15, %v1292_v59 }
 0x365   :  { %v1003_v11 = vpop.f32.mrf.mxu1 }
 0x366   :  { %1075 = vst [vmem:[#allocation7 + $0x60] sm:$0xff] %v1003_v11 }
 0x36a   :  { %v1045_v51 = vpop.f32.mrf.mxu3 }
 0x36b   :  { %1089 = vst [vmem:[#allocation7 + $0xd0] sm:$0xff] %v1045_v51 }
 0x36d   :  { %v1006_v49 = vpop.f32.mrf.mxu1 }
 0x36e   :  { %1076 = vst [vmem:[#allocation7 + $0x68] sm:$0xff] %v1006_v49 }
 0x372   :  { %v1048_v42 = vpop.f32.mrf.mxu3 }
 0x373   :  { %1090 = vst [vmem:[#allocation7 + $0xd8] sm:$0xff] %v1048_v42 }
 0x375   :  { %v1009_v34 = vpop.f32.mrf.mxu1 }
 0x376   :  { %1077 = vst [vmem:[#allocation7 + $0x70] sm:$0xff] %v1009_v34 }
 0x393   :  { %v1051_v38 = vpop.f32.mrf.mxu3 }
 0x394   :  { %1091 = vst [vmem:[#allocation7 + $0xe0] sm:$0xff] %v1051_v38 }
 0x39b   :  { %v1054_v18 = vpop.f32.mrf.mxu3 }
 0x39c   :  { %1092 = vst [vmem:[#allocation7 + $0xe8] sm:$0xff] %v1054_v18 }
 0x39d   :  { %v1012_v7 = vpop.f32.mrf.mxu1 }
 0x39e   :  { %1078 = vst [vmem:[#allocation7 + $0x78] sm:$0xff] %v1012_v7 }
 0x3a3   :  { %v1057_v39 = vpop.f32.mrf.mxu3 }
 0x3a4   :  { %1093 = vst [vmem:[#allocation7 + $0xf0] sm:$0xff] %v1057_v39 }
 0x3be   :  { %v1015_v50 = vpop.f32.mrf.mxu1 }
 0x3bf   :  { %1079 = vst [vmem:[#allocation7 + $0x80] sm:$0xff] %v1015_v50 }
 0x3d8   :  { %v1060_v59 = vpop.f32.mrf.mxu3 }
 0x3d9   :  { %1094 = vst [vmem:[#allocation7 + $0xf8] sm:$0xff] %v1060_v59 }
 0x3da   :  { %v1018_v9 = vpop.f32.mrf.mxu1 }
 0x3db   :  { %1080 = vst [vmem:[#allocation7 + $0x88] sm:$0xff] %v1018_v9 }
 0x3dc   :  { %1107 = dma.vmem_to_hbm [thread:$0]  %s1100_s24, 4096, %s1102_s27, [#allocation4], %s1289_s20, %s1289_s20, %s1290_s21  }
 0x3dd   :  { %1286 = dma.done.wait [#allocation4], 4096  }
 0x3de   :  { %1287 = vsyncadd [#allocation4], 4294963200 }
 0x3df   :  { %1112 = vsyncpa [#allocation3], 1 }
 0x3e0   :  { %1113 = vsyncpa [#allocation6], 1 }
 0x3e1   :  { %1114 = vsyncpa [#allocation4], 1 }

</bundles_post_ra>
